<compile_context>
chip_gen: v7x
topology: tpu7x:2x2x1
jax: 0.10.0
libtpu: 0.0.40
codegen_flags: <defaults>
</compile_context>

<pallas_src>
import math

import jax
import jax.numpy as jnp
from jax.experimental import pallas as pl
from jax.experimental.pallas import tpu as pltpu

IN_FEATURES = 244          # imfeat columns (244-feature CSV in the reference code)
N_COLS = 13                # col1..col13, each (N, 1)
H1, H2, H3 = 1000, 500, 100
OUT_FEATURES = 15          # num_durations -> LogisticHazard out_features
BN_EPS = 1e-5


def _round_up(a, b):
    return (a + b - 1) // b * b


# lane / MXU-friendly padded sizes
COL_P = 16
H1_P = _round_up(H1, 128)            # 1024
H2_P = _round_up(H2, 128)            # 512
H3_P = _round_up(H3, 128)            # 128
OUT_P = _round_up(OUT_FEATURES, 128)  # 128

DEFAULT_TILE_N = 512                 # fits comfortably under v7x's 64 MiB VMEM


# ----------------------------------------------------------------------------
# Kernel
# ----------------------------------------------------------------------------
def _survnet_kernel(x_ref, c_ref,
                    w1_ref, b1_ref,
                    w2a_ref, w2b_ref, b2_ref,
                    w3_ref, b3_ref,
                    w4_ref, b4_ref,
                    o_ref):
    # fc1 -> ReLU                (BN1 folded into w2a/b2; dropout = identity)
    h1 = jnp.dot(x_ref[...], w1_ref[...], preferred_element_type=jnp.float32)
    h1 = jnp.maximum(h1 + b1_ref[...], 0.0)

    # fc2 over [bn1(h1) | cols] -> ReLU        (BN2 folded into w3/b3)
    h2 = jnp.dot(h1.astype(jnp.bfloat16), w2a_ref[...],
                 preferred_element_type=jnp.float32)
    h2 = h2 + jnp.dot(c_ref[...], w2b_ref[...],
                      preferred_element_type=jnp.float32)
    h2 = jnp.maximum(h2 + b2_ref[...], 0.0)

    # fc3 -> ReLU                              (BN3 folded into w4/b4)
    h3 = jnp.dot(h2.astype(jnp.bfloat16), w3_ref[...],
                 preferred_element_type=jnp.float32)
    h3 = jnp.maximum(h3 + b3_ref[...], 0.0)

    # fc4
    o = jnp.dot(h3.astype(jnp.bfloat16), w4_ref[...],
                preferred_element_type=jnp.float32)
    o_ref[...] = o + b4_ref[...]


# ----------------------------------------------------------------------------
# Parameters (PyTorch-style raw params + folded/padded kernel params)
# ----------------------------------------------------------------------------
def _linear_init(key, fan_in, fan_out):
    kw, kb = jax.random.split(key)
    bound = 1.0 / math.sqrt(fan_in)
    w = jax.random.uniform(kw, (fan_in, fan_out), jnp.float32, -bound, bound)
    b = jax.random.uniform(kb, (fan_out,), jnp.float32, -bound, bound)
    return w, b


def _bn_init(key, feat):
    # non-trivial "trained" BN stats so the folding is actually exercised
    kg, kb, km, kv = jax.random.split(key, 4)
    return dict(
        gamma=jax.random.uniform(kg, (feat,), jnp.float32, 0.5, 1.5),
        beta=0.1 * jax.random.normal(kb, (feat,), jnp.float32),
        mean=0.1 * jax.random.normal(km, (feat,), jnp.float32),
        var=jax.random.uniform(kv, (feat,), jnp.float32, 0.5, 1.5))


def make_params(key, in_features=IN_FEATURES):
    k1, k2, k3, k4, kb1, kb2, kb3 = jax.random.split(key, 7)
    w1, b1 = _linear_init(k1, in_features, H1)
    w2, b2 = _linear_init(k2, H1 + N_COLS, H2)
    w3, b3 = _linear_init(k3, H2, H3)
    w4, b4 = _linear_init(k4, H3, OUT_FEATURES)
    return dict(w1=w1, b1=b1, w2=w2, b2=b2, w3=w3, b3=b3, w4=w4, b4=b4,
                bn1=_bn_init(kb1, H1), bn2=_bn_init(kb2, H2),
                bn3=_bn_init(kb3, H3))


def _bn_affine(bn):
    s = bn['gamma'] / jnp.sqrt(bn['var'] + BN_EPS)
    t = bn['beta'] - bn['mean'] * s
    return s, t


def _pad2(a, rows, cols, dtype):
    r, c = a.shape
    return jnp.pad(a, ((0, rows - r), (0, cols - c))).astype(dtype)


def prep_kernel_params(p, in_features=IN_FEATURES):
    """Fold BN affines into the downstream linears, pad to lane sizes, cast
    matmul operands to bf16 (biases stay f32)."""
    in_p = _round_up(in_features, 128)
    s1, t1 = _bn_affine(p['bn1'])
    s2, t2 = _bn_affine(p['bn2'])
    s3, t3 = _bn_affine(p['bn3'])

    w2a, w2b = p['w2'][:H1], p['w2'][H1:]          # (1000,500), (13,500)

    w2a_f = w2a * s1[:, None]
    b2_f = p['b2'] + t1 @ w2a
    w3_f = p['w3'] * s2[:, None]
    b3_f = p['b3'] + t2 @ p['w3']
    w4_f = p['w4'] * s3[:, None]
    b4_f = p['b4'] + t3 @ p['w4']

    return dict(
        w1=_pad2(p['w1'], in_p, H1_P, jnp.bfloat16),
        b1=_pad2(p['b1'][None, :], 1, H1_P, jnp.float32),
        w2a=_pad2(w2a_f, H1_P, H2_P, jnp.bfloat16),
        w2b=_pad2(w2b, COL_P, H2_P, jnp.bfloat16),
        b2=_pad2(b2_f[None, :], 1, H2_P, jnp.float32),
        w3=_pad2(w3_f, H2_P, H3_P, jnp.bfloat16),
        b3=_pad2(b3_f[None, :], 1, H3_P, jnp.float32),
        w4=_pad2(w4_f, H3_P, OUT_P, jnp.bfloat16),
        b4=_pad2(b4_f[None, :], 1, OUT_P, jnp.float32),
    )


# ----------------------------------------------------------------------------
# Wrapper
# ----------------------------------------------------------------------------
def survnet_2_5_forward(imfeat, cols, kparams, tile_n=DEFAULT_TILE_N):
    assert len(cols) == N_COLS
    n, in_features = imfeat.shape
    in_p = _round_up(in_features, 128)

    # pack/pad kernel inputs (fuses with the kernel input read under jit)
    x = jnp.pad(imfeat.astype(jnp.float32),
                ((0, 0), (0, in_p - in_features))).astype(jnp.bfloat16)
    c = jnp.concatenate(cols, axis=1).astype(jnp.float32)
    c = jnp.pad(c, ((0, 0), (0, COL_P - N_COLS))).astype(jnp.bfloat16)

    tile_n = min(tile_n, _round_up(n, 8))
    grid = (pl.cdiv(n, tile_n),)

    row = lambda f: pl.BlockSpec((tile_n, f), lambda i: (i, 0))      # batch-tiled
    res = lambda r, f: pl.BlockSpec((r, f), lambda i: (0, 0))        # VMEM-resident

    kp = kparams
    flops = 2 * n * (in_p * H1_P + H1_P * H2_P + COL_P * H2_P
                     + H2_P * H3_P + H3_P * OUT_P)
    bytes_accessed = (x.size * 2 + c.size * 2 + n * OUT_P * 4
                      + sum(int(v.size) * v.dtype.itemsize for v in kp.values()))

    out = pl.pallas_call(
        _survnet_kernel,
        out_shape=jax.ShapeDtypeStruct((n, OUT_P), jnp.float32),
        grid=grid,
        in_specs=[
            row(in_p), row(COL_P),
            res(in_p, H1_P), res(1, H1_P),
            res(H1_P, H2_P), res(COL_P, H2_P), res(1, H2_P),
            res(H2_P, H3_P), res(1, H3_P),
            res(H3_P, OUT_P), res(1, OUT_P),
        ],
        out_specs=row(OUT_P),
        compiler_params=pltpu.CompilerParams(
            dimension_semantics=("parallel",),
            vmem_limit_bytes=40 * 1024 * 1024),
        cost_estimate=pl.CostEstimate(
            flops=flops, transcendentals=0, bytes_accessed=bytes_accessed),
    )(x, c,
      kp['w1'], kp['b1'],
      kp['w2a'], kp['w2b'], kp['b2'],
      kp['w3'], kp['b3'],
      kp['w4'], kp['b4'])

    return out[:, :OUT_FEATURES]


# ----------------------------------------------------------------------------
# References
# ----------------------------------------------------------------------------
def _reference_f32(imfeat, cols, p):
    """Eval-mode semantics of the PyTorch module, pure f32, unfolded."""
    def bn(h, b):
        s = b['gamma'] / jnp.sqrt(b['var'] + BN_EPS)
        return (h - b['mean']) * s + b['beta']
    x = imfeat.astype(jnp.float32)
    h = jnp.maximum(x @ p['w1'] + p['b1'], 0.0)
    h = bn(h, p['bn1'])
    merged = jnp.concatenate([h] + [cc.astype(jnp.float32) for cc in cols], axis=1)
    h = jnp.maximum(merged @ p['w2'] + p['b2'], 0.0)
    h = bn(h, p['bn2'])
    h = jnp.maximum(h @ p['w3'] + p['b3'], 0.0)
    h = bn(h, p['bn3'])
    return h @ p['w4'] + p['b4']


def _reference_matched(imfeat, cols, kp):
    """Same folded/padded bf16 params and casts as the kernel (plain XLA)."""
    n, in_features = imfeat.shape
    in_p = _round_up(in_features, 128)
    x = jnp.pad(imfeat.astype(jnp.float32),
                ((0, 0), (0, in_p - in_features))).astype(jnp.bfloat16)
    c = jnp.concatenate(cols, axis=1).astype(jnp.float32)
    c = jnp.pad(c, ((0, 0), (0, COL_P - N_COLS))).astype(jnp.bfloat16)
    h1 = jnp.maximum(jnp.dot(x, kp['w1'], preferred_element_type=jnp.float32)
                     + kp['b1'], 0.0)
    h2 = (jnp.dot(h1.astype(jnp.bfloat16), kp['w2a'],
                  preferred_element_type=jnp.float32)
          + jnp.dot(c, kp['w2b'], preferred_element_type=jnp.float32))
    h2 = jnp.maximum(h2 + kp['b2'], 0.0)
    h3 = jnp.maximum(jnp.dot(h2.astype(jnp.bfloat16), kp['w3'],
                             preferred_element_type=jnp.float32)
                     + kp['b3'], 0.0)
    o = jnp.dot(h3.astype(jnp.bfloat16), kp['w4'],
                preferred_element_type=jnp.float32) + kp['b4']
    return o[:, :OUT_FEATURES]


# ----------------------------------------------------------------------------
if __name__ == "__main__":
    key = jax.random.PRNGKey(0)
    kparam_key, kx_key, kc_key = jax.random.split(key, 3)

    N = 32
    params = make_params(kparam_key, IN_FEATURES)
    kparams = prep_kernel_params(params, IN_FEATURES)

    imfeat = jax.random.normal(kx_key, (N, IN_FEATURES), jnp.float32)
    col_keys = jax.random.split(kc_key, N_COLS)
    cols = [jax.random.normal(k, (N, 1), jnp.float32) for k in col_keys]

    fwd = jax.jit(lambda x, c: survnet_2_5_forward(x, c, kparams))
    y = fwd(imfeat, cols)
    jax.block_until_ready(y)

    assert y.shape == (N, OUT_FEATURES)

    y_match = _reference_matched(imfeat, cols, kparams)
    y_f32 = _reference_f32(imfeat, cols, params)
    assert jnp.allclose(y, y_match, atol=2e-3, rtol=2e-3), \
        float(jnp.max(jnp.abs(y - y_match)))
    assert jnp.allclose(y, y_f32, atol=1e-1, rtol=1e-1), \
        float(jnp.max(jnp.abs(y - y_f32)))

    # TODO(synk): training-mode BatchNorm (batch statistics) and stochastic
    # Dropout are not implemented; this kernel covers eval/inference only.
    print("KERNEL_OK")
</pallas_src>

<mosaic_0001>
module attributes {stable_mosaic.version = 11 : i64} {
  func.func @_survnet_kernel(%arg0: i32, %arg1: memref<32x256xbf16, #tpu.memory_space<vmem>>, %arg2: memref<32x16xbf16, #tpu.memory_space<vmem>>, %arg3: memref<256x1024xbf16, #tpu.memory_space<vmem>>, %arg4: memref<1x1024xf32, #tpu.memory_space<vmem>>, %arg5: memref<1024x512xbf16, #tpu.memory_space<vmem>>, %arg6: memref<16x512xbf16, #tpu.memory_space<vmem>>, %arg7: memref<1x512xf32, #tpu.memory_space<vmem>>, %arg8: memref<512x128xbf16, #tpu.memory_space<vmem>>, %arg9: memref<1x128xf32, #tpu.memory_space<vmem>>, %arg10: memref<128x128xbf16, #tpu.memory_space<vmem>>, %arg11: memref<1x128xf32, #tpu.memory_space<vmem>>, %arg12: memref<32x128xf32, #tpu.memory_space<vmem>>) attributes {dimension_semantics = [#tpu.dimension_semantics<parallel>], iteration_bounds = array<i64: 1>, scalar_prefetch = 0 : i64, scratch_operands = 0 : i64, tpu.core_type = #tpu.core_type<tc>, window_params = [{transform_indices = @transform_0, window_bounds = array<i64: 32, 256>}, {transform_indices = @transform_1, window_bounds = array<i64: 32, 16>}, {pipeline_mode = #tpu.pipeline_mode<synchronous>, transform_indices = @transform_2, window_bounds = array<i64: 256, 1024>}, {pipeline_mode = #tpu.pipeline_mode<synchronous>, transform_indices = @transform_3, window_bounds = array<i64: 1, 1024>}, {pipeline_mode = #tpu.pipeline_mode<synchronous>, transform_indices = @transform_4, window_bounds = array<i64: 1024, 512>}, {pipeline_mode = #tpu.pipeline_mode<synchronous>, transform_indices = @transform_5, window_bounds = array<i64: 16, 512>}, {pipeline_mode = #tpu.pipeline_mode<synchronous>, transform_indices = @transform_6, window_bounds = array<i64: 1, 512>}, {pipeline_mode = #tpu.pipeline_mode<synchronous>, transform_indices = @transform_7, window_bounds = array<i64: 512, 128>}, {pipeline_mode = #tpu.pipeline_mode<synchronous>, transform_indices = @transform_8, window_bounds = array<i64: 1, 128>}, {pipeline_mode = #tpu.pipeline_mode<synchronous>, transform_indices = @transform_9, window_bounds = array<i64: 128, 128>}, {pipeline_mode = #tpu.pipeline_mode<synchronous>, transform_indices = @transform_10, window_bounds = array<i64: 1, 128>}, {transform_indices = @transform_11, window_bounds = array<i64: 32, 128>}]} {
    %c0 = arith.constant 0 : index
    %c0_0 = arith.constant 0 : index
    %0 = vector.load %arg1[%c0, %c0_0] : memref<32x256xbf16, #tpu.memory_space<vmem>>, vector<32x256xbf16>
    %c0_1 = arith.constant 0 : index
    %c0_2 = arith.constant 0 : index
    %1 = vector.load %arg3[%c0_1, %c0_2] : memref<256x1024xbf16, #tpu.memory_space<vmem>>, vector<256x1024xbf16>
    %cst = arith.constant dense<0.000000e+00> : vector<32x1024xf32>
    %2 = tpu.matmul %0, %1, %cst {dimension_numbers = #tpu.dot_dimension_numbers<[1], [0], [0], [1], [0, 0, 1, 1], [], []>} : vector<32x256xbf16>, vector<256x1024xbf16>, vector<32x1024xf32> -> vector<32x1024xf32>
    %c0_3 = arith.constant 0 : index
    %c0_4 = arith.constant 0 : index
    %3 = vector.load %arg4[%c0_3, %c0_4] : memref<1x1024xf32, #tpu.memory_space<vmem>>, vector<1x1024xf32>
    %4 = vector.broadcast %3 : vector<1x1024xf32> to vector<32x1024xf32>
    %5 = arith.addf %2, %4 : vector<32x1024xf32>
    %cst_5 = arith.constant 0.000000e+00 : f32
    %6 = vector.broadcast %cst_5 : f32 to vector<32x1024xf32>
    %7 = arith.maximumf %5, %6 : vector<32x1024xf32>
    %8 = arith.truncf %7 : vector<32x1024xf32> to vector<32x1024xbf16>
    %c0_6 = arith.constant 0 : index
    %c0_7 = arith.constant 0 : index
    %9 = vector.load %arg5[%c0_6, %c0_7] : memref<1024x512xbf16, #tpu.memory_space<vmem>>, vector<1024x512xbf16>
    %cst_8 = arith.constant dense<0.000000e+00> : vector<32x512xf32>
    %10 = tpu.matmul %8, %9, %cst_8 {dimension_numbers = #tpu.dot_dimension_numbers<[1], [0], [0], [1], [0, 0, 1, 1], [], []>} : vector<32x1024xbf16>, vector<1024x512xbf16>, vector<32x512xf32> -> vector<32x512xf32>
    %c0_9 = arith.constant 0 : index
    %c0_10 = arith.constant 0 : index
    %11 = vector.load %arg2[%c0_9, %c0_10] : memref<32x16xbf16, #tpu.memory_space<vmem>>, vector<32x16xbf16>
    %c0_11 = arith.constant 0 : index
    %c0_12 = arith.constant 0 : index
    %12 = vector.load %arg6[%c0_11, %c0_12] : memref<16x512xbf16, #tpu.memory_space<vmem>>, vector<16x512xbf16>
    %cst_13 = arith.constant dense<0.000000e+00> : vector<32x512xf32>
    %13 = tpu.matmul %11, %12, %cst_13 {dimension_numbers = #tpu.dot_dimension_numbers<[1], [0], [0], [1], [0, 0, 1, 1], [], []>} : vector<32x16xbf16>, vector<16x512xbf16>, vector<32x512xf32> -> vector<32x512xf32>
    %14 = arith.addf %10, %13 : vector<32x512xf32>
    %c0_14 = arith.constant 0 : index
    %c0_15 = arith.constant 0 : index
    %15 = vector.load %arg7[%c0_14, %c0_15] : memref<1x512xf32, #tpu.memory_space<vmem>>, vector<1x512xf32>
    %16 = vector.broadcast %15 : vector<1x512xf32> to vector<32x512xf32>
    %17 = arith.addf %14, %16 : vector<32x512xf32>
    %cst_16 = arith.constant 0.000000e+00 : f32
    %18 = vector.broadcast %cst_16 : f32 to vector<32x512xf32>
    %19 = arith.maximumf %17, %18 : vector<32x512xf32>
    %20 = arith.truncf %19 : vector<32x512xf32> to vector<32x512xbf16>
    %c0_17 = arith.constant 0 : index
    %c0_18 = arith.constant 0 : index
    %21 = vector.load %arg8[%c0_17, %c0_18] : memref<512x128xbf16, #tpu.memory_space<vmem>>, vector<512x128xbf16>
    %cst_19 = arith.constant dense<0.000000e+00> : vector<32x128xf32>
    %22 = tpu.matmul %20, %21, %cst_19 {dimension_numbers = #tpu.dot_dimension_numbers<[1], [0], [0], [1], [0, 0, 1, 1], [], []>} : vector<32x512xbf16>, vector<512x128xbf16>, vector<32x128xf32> -> vector<32x128xf32>
    %c0_20 = arith.constant 0 : index
    %c0_21 = arith.constant 0 : index
    %23 = vector.load %arg9[%c0_20, %c0_21] : memref<1x128xf32, #tpu.memory_space<vmem>>, vector<1x128xf32>
    %24 = vector.broadcast %23 : vector<1x128xf32> to vector<32x128xf32>
    %25 = arith.addf %22, %24 : vector<32x128xf32>
    %cst_22 = arith.constant 0.000000e+00 : f32
    %26 = vector.broadcast %cst_22 : f32 to vector<32x128xf32>
    %27 = arith.maximumf %25, %26 : vector<32x128xf32>
    %28 = arith.truncf %27 : vector<32x128xf32> to vector<32x128xbf16>
    %c0_23 = arith.constant 0 : index
    %c0_24 = arith.constant 0 : index
    %29 = vector.load %arg10[%c0_23, %c0_24] : memref<128x128xbf16, #tpu.memory_space<vmem>>, vector<128x128xbf16>
    %cst_25 = arith.constant dense<0.000000e+00> : vector<32x128xf32>
    %30 = tpu.matmul %28, %29, %cst_25 {dimension_numbers = #tpu.dot_dimension_numbers<[1], [0], [0], [1], [0, 0, 1, 1], [], []>} : vector<32x128xbf16>, vector<128x128xbf16>, vector<32x128xf32> -> vector<32x128xf32>
    %c0_26 = arith.constant 0 : index
    %c0_27 = arith.constant 0 : index
    %31 = vector.load %arg11[%c0_26, %c0_27] : memref<1x128xf32, #tpu.memory_space<vmem>>, vector<1x128xf32>
    %32 = vector.broadcast %31 : vector<1x128xf32> to vector<32x128xf32>
    %33 = arith.addf %30, %32 : vector<32x128xf32>
    %c0_28 = arith.constant 0 : index
    %c0_29 = arith.constant 0 : index
    %34 = vector.load %arg12[%c0_28, %c0_29] : memref<32x128xf32, #tpu.memory_space<vmem>>, vector<32x128xf32>
    tpu.vector_store %arg12[%c0_28, %c0_29], %33 {strides = array<i32>} : memref<32x128xf32, #tpu.memory_space<vmem>>, vector<32x128xf32>,
    return
  }
  func.func @transform_0(%arg0: i32) -> (i32, i32) {
    %c0_i32 = arith.constant 0 : i32
    %c0_i32_0 = arith.constant 0 : i32
    return %arg0, %c0_i32 : i32, i32
  }
  func.func @transform_1(%arg0: i32) -> (i32, i32) {
    %c0_i32 = arith.constant 0 : i32
    %c0_i32_0 = arith.constant 0 : i32
    return %arg0, %c0_i32 : i32, i32
  }
  func.func @transform_2(%arg0: i32) -> (i32, i32) {
    %c0_i32 = arith.constant 0 : i32
    %c0_i32_0 = arith.constant 0 : i32
    %c0_i32_1 = arith.constant 0 : i32
    return %c0_i32, %c0_i32_0 : i32, i32
  }
  func.func @transform_3(%arg0: i32) -> (i32, i32) {
    %c0_i32 = arith.constant 0 : i32
    %c0_i32_0 = arith.constant 0 : i32
    %c0_i32_1 = arith.constant 0 : i32
    return %c0_i32, %c0_i32_0 : i32, i32
  }
  func.func @transform_4(%arg0: i32) -> (i32, i32) {
    %c0_i32 = arith.constant 0 : i32
    %c0_i32_0 = arith.constant 0 : i32
    %c0_i32_1 = arith.constant 0 : i32
    return %c0_i32, %c0_i32_0 : i32, i32
  }
  func.func @transform_5(%arg0: i32) -> (i32, i32) {
    %c0_i32 = arith.constant 0 : i32
    %c0_i32_0 = arith.constant 0 : i32
    %c0_i32_1 = arith.constant 0 : i32
    return %c0_i32, %c0_i32_0 : i32, i32
  }
  func.func @transform_6(%arg0: i32) -> (i32, i32) {
    %c0_i32 = arith.constant 0 : i32
    %c0_i32_0 = arith.constant 0 : i32
    %c0_i32_1 = arith.constant 0 : i32
    return %c0_i32, %c0_i32_0 : i32, i32
  }
  func.func @transform_7(%arg0: i32) -> (i32, i32) {
    %c0_i32 = arith.constant 0 : i32
    %c0_i32_0 = arith.constant 0 : i32
    %c0_i32_1 = arith.constant 0 : i32
    return %c0_i32, %c0_i32_0 : i32, i32
  }
  func.func @transform_8(%arg0: i32) -> (i32, i32) {
    %c0_i32 = arith.constant 0 : i32
    %c0_i32_0 = arith.constant 0 : i32
    %c0_i32_1 = arith.constant 0 : i32
    return %c0_i32, %c0_i32_0 : i32, i32
  }
  func.func @transform_9(%arg0: i32) -> (i32, i32) {
    %c0_i32 = arith.constant 0 : i32
    %c0_i32_0 = arith.constant 0 : i32
    %c0_i32_1 = arith.constant 0 : i32
    return %c0_i32, %c0_i32_0 : i32, i32
  }
  func.func @transform_10(%arg0: i32) -> (i32, i32) {
    %c0_i32 = arith.constant 0 : i32
    %c0_i32_0 = arith.constant 0 : i32
    %c0_i32_1 = arith.constant 0 : i32
    return %c0_i32, %c0_i32_0 : i32, i32
  }
  func.func @transform_11(%arg0: i32) -> (i32, i32) {
    %c0_i32 = arith.constant 0 : i32
    %c0_i32_0 = arith.constant 0 : i32
    return %arg0, %c0_i32 : i32, i32
  }
}

</mosaic_0001>

<bundles_post_ra>
// kernel: _lambda_.1
= control target key start
LH: loop header
LB: loop body
LE: loop exit
PB: predicated region body
PF: predicated region fallthrough
CT: control target
= control target key end

     0   :  { %vm1427_vm0 = vcmask 130048   ;;  %s6383_s2 = inlined_call_operand.vmem [shape: bf16[256,1024], index: 2, kind: input, shape index: {}]   ;;  %s6384_s0 = inlined_call_operand.vmem [shape: bf16[32,256], index: 0, kind: input, shape index: {}]   ;;  %s6385_s5 = inlined_call_operand.vmem [shape: bf16[16,512], index: 5, kind: input, shape index: {}]   ;;  %s6386_s1 = inlined_call_operand.vmem [shape: bf16[32,16], index: 1, kind: input, shape index: {}]   ;;  %s6387_s4 = inlined_call_operand.vmem [shape: bf16[1024,512], index: 4, kind: input, shape index: {}]   ;;  %s6388_s3 = inlined_call_operand.vmem [shape: f32[1,1024], index: 3, kind: input, shape index: {}]   ;;  %s6389_s7 = inlined_call_operand.vmem [shape: bf16[512,128], index: 7, kind: input, shape index: {}]   ;;  %s6390_s9 = inlined_call_operand.vmem [shape: bf16[128,128], index: 9, kind: input, shape index: {}]   ;;  %s6391_s6 = inlined_call_operand.vmem [shape: f32[1,512], index: 6, kind: input, shape index: {}]   ;;  %s6392_s8 = inlined_call_operand.vmem [shape: f32[1,128], index: 8, kind: input, shape index: {}]   ;;  %s6393_s10 = inlined_call_operand.vmem [shape: f32[1,128], index: 10, kind: input, shape index: {}]   ;;  %s6394_s11 = inlined_call_operand.vmem [shape: f32[32,128], index: 11, kind: output, shape index: {}]  }
   0x1   :  { %v43_v0 = vld [vmem:[%s6383_s2] sm:$0xff]  ;;  %v44_v17 = vld [vmem:[%s6383_s2 + $0x8] sm:$0xff] }
   0x2   :  { %v47_v1 = vld [vmem:[%s6383_s2 + $0x20] sm:$0xff]  ;;  %v48_v18 = vld [vmem:[%s6383_s2 + $0x28] sm:$0xff] }
   0x3   :  { %v51_v2 = vld [vmem:[%s6383_s2 + $0x40] sm:$0xff]  ;;  %v3806_v3 = vcombine.high %v43_v0, %v47_v1  ;;  %v3805_v4 = vcombine.low %v43_v0, %v47_v1  ;;  %v3808_v20 = vcombine.high %v44_v17, %v48_v18  ;;  %v3807_v21 = vcombine.low %v44_v17, %v48_v18  ;;  %v52_v23 = vld [vmem:[%s6383_s2 + $0x48] sm:$0xff] }
   0x4   :  { %v55_v5 = vld [vmem:[%s6383_s2 + $0x60] sm:$0xff]  ;;  %v56_v25 = vld [vmem:[%s6383_s2 + $0x68] sm:$0xff] }
   0x5   :  { %v3814_v6 = vcombine.high %v51_v2, %v55_v5  ;;  %v59_v7 = vld [vmem:[%s6383_s2 + $0x80] sm:$0xff]  ;;  %873 = vmatprep.subr.bf16.mxu0 %v3806_v3  ;;  %v3813_v9 = vcombine.low %v51_v2, %v55_v5  ;;  %v60_v26 = vld [vmem:[%s6383_s2 + $0x88] sm:$0xff]  ;;  %926 = vmatprep.subr.bf16.mxu1 %v3808_v20  ;;  %v3816_v30 = vcombine.high %v52_v23, %v56_v25 }
   0x6   :  { %v63_v8 = vld [vmem:[%s6383_s2 + $0xa0] sm:$0xff]  ;;  %874 = vmatpush1.bf16.msra.mxu0 %v3805_v4  ;;  %v64_v27 = vld [vmem:[%s6383_s2 + $0xa8] sm:$0xff]  ;;  %927 = vmatpush1.bf16.msra.mxu1 %v3807_v21  ;;  %v3815_v31 = vcombine.low %v52_v23, %v56_v25 }
   0x7   :  { %875 = vmatprep.subr.bf16.mxu0 %v3814_v6  ;;  %v3822_v10 = vcombine.high %v59_v7, %v63_v8  ;;  %v67_v11 = vld [vmem:[%s6383_s2 + $0xc0] sm:$0xff]  ;;  %v3821_v13 = vcombine.low %v59_v7, %v63_v8  ;;  %928 = vmatprep.subr.bf16.mxu1 %v3816_v30  ;;  %v3824_v33 = vcombine.high %v60_v26, %v64_v27  ;;  %v68_v35 = vld [vmem:[%s6383_s2 + $0xc8] sm:$0xff] }
   0x8   :  { %v71_v12 = vld [vmem:[%s6383_s2 + $0xe0] sm:$0xff]  ;;  %v72_v36 = vld [vmem:[%s6383_s2 + $0xe8] sm:$0xff]  ;;  %v3823_v39 = vcombine.low %v60_v26, %v64_v27 }
   0x9   :  { %v3830_v14 = vcombine.high %v67_v11, %v71_v12  ;;  %v75_v15 = vld [vmem:[%s6383_s2 + $0x100] sm:$0xff]  ;;  %v3829_v19 = vcombine.low %v67_v11, %v71_v12  ;;  %v3832_v41 = vcombine.high %v68_v35, %v72_v36  ;;  %v76_v42 = vld [vmem:[%s6383_s2 + $0x108] sm:$0xff]  ;;  %v3831_v47 = vcombine.low %v68_v35, %v72_v36 }
   0xa   :  { %876 = vmatpush1.bf16.msra.mxu0 %v3813_v9  ;;  %v79_v16 = vld [vmem:[%s6383_s2 + $0x120] sm:$0xff]  ;;  %929 = vmatpush1.bf16.msra.mxu1 %v3815_v31  ;;  %v80_v44 = vld [vmem:[%s6383_s2 + $0x128] sm:$0xff] }
   0xb   :  { %877 = vmatprep.subr.bf16.mxu0 %v3822_v10  ;;  %v4930_v22 = vld [vmem:[%s6384_s0 + $0x4] ss:$8 sps:$4 sm:$0xff]   ;;  %v3838_v24 = vcombine.high %v75_v15, %v79_v16  ;;  %v3837_v32 = vcombine.low %v75_v15, %v79_v16  ;;  %930 = vmatprep.subr.bf16.mxu1 %v3824_v33  ;;  %v3840_v49 = vcombine.high %v76_v42, %v80_v44 }
   0xc   :  { %v83_v28 = vld [vmem:[%s6383_s2 + $0x140] sm:$0xff]  ;;  %905 = vmatprep.mubr.bf16.mxu0 %v4930_v22  ;;  %958 = vmatprep.mubr.bf16.mxu1 %v4930_v22  ;;  %v84_v51 = vld [vmem:[%s6383_s2 + $0x148] sm:$0xff]  ;;  %v3839_v55 = vcombine.low %v76_v42, %v80_v44 }
   0xd   :  { %v87_v29 = vld [vmem:[%s6383_s2 + $0x160] sm:$0xff]  ;;  %v88_v52 = vld [vmem:[%s6383_s2 + $0x168] sm:$0xff] }
   0xe   :  { %878 = vmatpush1.bf16.msra.mxu0 %v3821_v13  ;;  %v3846_v34 = vcombine.high %v83_v28, %v87_v29  ;;  %v91_v37 = vld [vmem:[%s6383_s2 + $0x180] sm:$0xff]  ;;  %v3845_v40 = vcombine.low %v83_v28, %v87_v29  ;;  %931 = vmatpush1.bf16.msra.mxu1 %v3823_v39  ;;  %v3848_v57 = vcombine.high %v84_v51, %v88_v52  ;;  %v92_v59 = vld [vmem:[%s6383_s2 + $0x188] sm:$0xff] }
   0xf   :  { %879 = vmatprep.subr.bf16.mxu0 %v3830_v14  ;;  %v95_v38 = vld [vmem:[%s6383_s2 + $0x1a0] sm:$0xff]  ;;  %932 = vmatprep.subr.bf16.mxu1 %v3832_v41  ;;  %v96_v60 = vld [vmem:[%s6383_s2 + $0x1a8] sm:$0xff]  ;;  %v3847_v63 = vcombine.low %v84_v51, %v88_v52 }
  0x10   :  { %v3854_v43 = vcombine.high %v91_v37, %v95_v38  ;;  %v99_v45 = vld [vmem:[%s6383_s2 + $0x1c0] sm:$0xff]  ;;  %v3853_v48 = vcombine.low %v91_v37, %v95_v38  ;;  %v3856_v1 = vcombine.high %v92_v59, %v96_v60  ;;  %v100_v3 = vld [vmem:[%s6383_s2 + $0x1c8] sm:$0xff]  ;;  %v3855_v7 = vcombine.low %v92_v59, %v96_v60 }
  0x11   :  { %v103_v46 = vld [vmem:[%s6383_s2 + $0x1e0] sm:$0xff]  ;;  %v104_v4 = vld [vmem:[%s6383_s2 + $0x1e8] sm:$0xff] }
  0x12   :  { %880 = vmatpush1.bf16.msra.mxu0 %v3829_v19  ;;  %v3862_v50 = vcombine.high %v99_v45, %v103_v46  ;;  %v107_v53 = vld [vmem:[%s6383_s2 + $0x200] sm:$0xff]  ;;  %933 = vmatpush1.bf16.msra.mxu1 %v3831_v47  ;;  %v3861_v56 = vcombine.low %v99_v45, %v103_v46  ;;  %v3864_v9 = vcombine.high %v100_v3, %v104_v4  ;;  %v108_v11 = vld [vmem:[%s6383_s2 + $0x208] sm:$0xff] }
  0x13   :  { %881 = vmatprep.subr.bf16.mxu0 %v3838_v24  ;;  %v111_v54 = vld [vmem:[%s6383_s2 + $0x220] sm:$0xff]  ;;  %934 = vmatprep.subr.bf16.mxu1 %v3840_v49  ;;  %v112_v12 = vld [vmem:[%s6383_s2 + $0x228] sm:$0xff]  ;;  %v3863_v15 = vcombine.low %v100_v3, %v104_v4 }
  0x14   :  { %v3870_v58 = vcombine.high %v107_v53, %v111_v54  ;;  %v115_v61 = vld [vmem:[%s6383_s2 + $0x240] sm:$0xff]  ;;  %v3869_v0 = vcombine.low %v107_v53, %v111_v54  ;;  %v3872_v17 = vcombine.high %v108_v11, %v112_v12  ;;  %v116_v19 = vld [vmem:[%s6383_s2 + $0x248] sm:$0xff]  ;;  %v3871_v24 = vcombine.low %v108_v11, %v112_v12  ;;  %v45_v54 = vld [vmem:[%s6383_s2 + $0x10] sm:$0xff] }
  0x15   :  { %v119_v62 = vld [vmem:[%s6383_s2 + $0x260] sm:$0xff]  ;;  %v120_v20 = vld [vmem:[%s6383_s2 + $0x268] sm:$0xff]  ;;  %v46_v12 = vld [vmem:[%s6383_s2 + $0x18] sm:$0xff] }
  0x16   :  { %882 = vmatpush1.bf16.msra.mxu0 %v3837_v32  ;;  %935 = vmatpush1.bf16.msra.mxu1 %v3839_v55  ;;  %v3878_v2 = vcombine.high %v115_v61, %v119_v62  ;;  %v123_v5 = vld [vmem:[%s6383_s2 + $0x280] sm:$0xff]  ;;  %v3877_v8 = vcombine.low %v115_v61, %v119_v62  ;;  %v3880_v26 = vcombine.high %v116_v19, %v120_v20  ;;  %v124_v27 = vld [vmem:[%s6383_s2 + $0x288] sm:$0xff]  ;;  %v49_v55 = vld [vmem:[%s6383_s2 + $0x30] sm:$0xff] }
  0x17   :  { %883 = vmatprep.subr.bf16.mxu0 %v3846_v34  ;;  %936 = vmatprep.subr.bf16.mxu1 %v3848_v57  ;;  %v127_v6 = vld [vmem:[%s6383_s2 + $0x2a0] sm:$0xff]  ;;  %v128_v29 = vld [vmem:[%s6383_s2 + $0x2a8] sm:$0xff]  ;;  %v3879_v32 = vcombine.low %v116_v19, %v120_v20  ;;  %v3810_v62 = vcombine.high %v45_v54, %v49_v55  ;;  %v69_v19 = vld [vmem:[%s6383_s2 + $0xd0] sm:$0xff] }
  0x18   :  { %v3886_v10 = vcombine.high %v123_v5, %v127_v6  ;;  %v131_v13 = vld [vmem:[%s6383_s2 + $0x2c0] sm:$0xff]  ;;  %v3885_v16 = vcombine.low %v123_v5, %v127_v6  ;;  %v3888_v35 = vcombine.high %v124_v27, %v128_v29  ;;  %v132_v36 = vld [vmem:[%s6383_s2 + $0x2c8] sm:$0xff]  ;;  %v3809_v6 = vcombine.low %v45_v54, %v49_v55  ;;  %v73_v20 = vld [vmem:[%s6383_s2 + $0xf0] sm:$0xff] }
  0x19   :  { %v135_v14 = vld [vmem:[%s6383_s2 + $0x2e0] sm:$0xff]  ;;  %v136_v38 = vld [vmem:[%s6383_s2 + $0x2e8] sm:$0xff]  ;;  %v90_v55 = vld [vmem:[%s6383_s2 + $0x178] sm:$0xff] }
  0x1a   :  { %884 = vmatpush1.bf16.msra.mxu0 %v3845_v40  ;;  %937 = vmatpush1.bf16.msra.mxu1 %v3847_v63  ;;  %v3894_v18 = vcombine.high %v131_v13, %v135_v14  ;;  %v139_v21 = vld [vmem:[%s6383_s2 + $0x300] sm:$0xff]  ;;  %v3893_v25 = vcombine.low %v131_v13, %v135_v14  ;;  %v3887_v40 = vcombine.low %v124_v27, %v128_v29  ;;  %v140_v45 = vld [vmem:[%s6383_s2 + $0x308] sm:$0xff]  ;;  %v53_v63 = vld [vmem:[%s6383_s2 + $0x50] sm:$0xff] }
  0x1b   :  { %885 = vmatprep.subr.bf16.mxu0 %v3854_v43  ;;  %938 = vmatprep.subr.bf16.mxu1 %v3856_v1  ;;  %v143_v23 = vld [vmem:[%s6383_s2 + $0x320] sm:$0xff]  ;;  %v3896_v43 = vcombine.high %v132_v36, %v136_v38  ;;  %v144_v46 = vld [vmem:[%s6383_s2 + $0x328] sm:$0xff]  ;;  %v57_v1 = vld [vmem:[%s6383_s2 + $0x70] sm:$0xff] }
  0x1c   :  { %v3902_v28 = vcombine.high %v139_v21, %v143_v23  ;;  %v147_v30 = vld [vmem:[%s6383_s2 + $0x340] sm:$0xff]  ;;  %v3901_v33 = vcombine.low %v139_v21, %v143_v23  ;;  %v148_v51 = vld [vmem:[%s6383_s2 + $0x348] sm:$0xff]  ;;  %v50_v13 = vld [vmem:[%s6383_s2 + $0x38] sm:$0xff] }
  0x1d   :  { %v151_v31 = vld [vmem:[%s6383_s2 + $0x360] sm:$0xff]  ;;  %v152_v53 = vld [vmem:[%s6383_s2 + $0x368] sm:$0xff]  ;;  %v5129_v14 = vld [vmem:[%s6384_s0 + $0x10] ss:$8 sps:$4 sm:$0xff]   ;;  %v3812_v21 = vcombine.high %v46_v12, %v50_v13 }
  0x1e   :  { %886 = vmatpush1.bf16.msra.mxu0 %v3853_v48  ;;  %939 = vmatpush1.bf16.msra.mxu1 %v3855_v7  ;;  %v155_v34 = vld [vmem:[%s6383_s2 + $0x380] sm:$0xff]  ;;  %v3910_v37 = vcombine.high %v147_v30, %v151_v31  ;;  %v3909_v41 = vcombine.low %v147_v30, %v151_v31  ;;  %v3895_v48 = vcombine.low %v132_v36, %v136_v38  ;;  %v156_v60 = vld [vmem:[%s6383_s2 + $0x388] sm:$0xff]  ;;  %v58_v23 = vld [vmem:[%s6383_s2 + $0x78] sm:$0xff] }
  0x1f   :  { %887 = vmatprep.subr.bf16.mxu0 %v3862_v50  ;;  %940 = vmatprep.subr.bf16.mxu1 %v3864_v9  ;;  %v159_v39 = vld [vmem:[%s6383_s2 + $0x3a0] sm:$0xff]  ;;  %v3904_v50 = vcombine.high %v140_v45, %v144_v46  ;;  %v160_v61 = vld [vmem:[%s6383_s2 + $0x3a8] sm:$0xff]  ;;  %v3818_v7 = vcombine.high %v53_v63, %v57_v1  ;;  %v61_v9 = vld [vmem:[%s6383_s2 + $0x90] sm:$0xff] }
  0x20   :  { %v163_v42 = vld [vmem:[%s6383_s2 + $0x3c0] sm:$0xff]  ;;  %v3918_v44 = vcombine.high %v155_v34, %v159_v39  ;;  %v3917_v49 = vcombine.low %v155_v34, %v159_v39  ;;  %v3920_v3 = vcombine.high %v156_v60, %v160_v61  ;;  %v164_v4 = vld [vmem:[%s6383_s2 + $0x3c8] sm:$0xff]  ;;  %v62_v27 = vld [vmem:[%s6383_s2 + $0x98] sm:$0xff] }
  0x21   :  { %v167_v47 = vld [vmem:[%s6383_s2 + $0x3e0] sm:$0xff]  ;;  %v168_v5 = vld [vmem:[%s6383_s2 + $0x3e8] sm:$0xff]  ;;  %v81_v29 = vld [vmem:[%s6383_s2 + $0x130] sm:$0xff] }
  0x22   :  { %888 = vmatpush1.bf16.msra.mxu0 %v3861_v56  ;;  %941 = vmatpush1.bf16.msra.mxu1 %v3863_v15  ;;  %v3926_v52 = vcombine.high %v163_v42, %v167_v47  ;;  %v3903_v56 = vcombine.low %v140_v45, %v144_v46  ;;  %v3925_v57 = vcombine.low %v163_v42, %v167_v47  ;;  %v5087_v59 = vld [vmem:[%s6384_s0] ss:$8 sps:$4 sm:$0xff]   ;;  %v66_v31 = vld [vmem:[%s6383_s2 + $0xb8] sm:$0xff]  ;;  %v85_v36 = vld [vmem:[%s6383_s2 + $0x150] sm:$0xff] }
  0x23   :  { %889 = vmatprep.subr.bf16.mxu0 %v3870_v58  ;;  %942 = vmatprep.subr.bf16.mxu1 %v3872_v17  ;;  %v3912_v58 = vcombine.high %v148_v51, %v152_v53  ;;  %v3928_v11 = vcombine.high %v164_v4, %v168_v5  ;;  %v3817_v15 = vcombine.low %v53_v63, %v57_v1  ;;  %v74_v39 = vld [vmem:[%s6383_s2 + $0xf8] sm:$0xff]  ;;  %v97_v45 = vld [vmem:[%s6383_s2 + $0x1b0] sm:$0xff] }
  0x24   :  { %v3927_v17 = vcombine.low %v164_v4, %v168_v5  ;;  %v3828_v38 = vcombine.high %v62_v27, %v66_v31  ;;  %v3827_v42 = vcombine.low %v62_v27, %v66_v31  ;;  %v82_v47 = vld [vmem:[%s6383_s2 + $0x138] sm:$0xff]  ;;  %v117_v5 = vld [vmem:[%s6383_s2 + $0x250] sm:$0xff] }
  0x25   :  { %v98_v63 = vld [vmem:[%s6383_s2 + $0x1b8] sm:$0xff] }
  0x26   :  { %890 = vmatpush1.bf16.msra.mxu0 %v3869_v0  ;;  %943 = vmatpush1.bf16.msra.mxu1 %v3871_v24  ;;  %v3911_v0 = vcombine.low %v148_v51, %v152_v53  ;;  %v86_v51 = vld [vmem:[%s6383_s2 + $0x158] sm:$0xff]  ;;  %v105_v53 = vld [vmem:[%s6383_s2 + $0x1f0] sm:$0xff] }
  0x27   :  { %891 = vmatprep.subr.bf16.mxu0 %v3878_v2  ;;  %944 = vmatprep.subr.bf16.mxu1 %v3880_v26  ;;  %v5104_v2 = vld [vmem:[%s6384_s0 + $0x14] ss:$8 sps:$4 sm:$0xff]   ;;  %v3811_v26 = vcombine.low %v46_v12, %v50_v13 }
  0x28   :  { %v102_v4 = vld [vmem:[%s6383_s2 + $0x1d8] sm:$0xff] }
  0x2a   :  { %892 = vmatpush1.bf16.msra.mxu0 %v3877_v8  ;;  %945 = vmatpush1.bf16.msra.mxu1 %v3879_v32  ;;  %v3919_v8 = vcombine.low %v156_v60, %v160_v61  ;;  %v3833_v32 = vcombine.low %v69_v19, %v73_v20  ;;  %v94_v60 = vld [vmem:[%s6383_s2 + $0x198] sm:$0xff]  ;;  %v113_v61 = vld [vmem:[%s6383_s2 + $0x230] sm:$0xff] }
  0x2b   :  { %893 = vmatprep.subr.bf16.mxu0 %v3886_v10  ;;  %946 = vmatprep.subr.bf16.mxu1 %v3888_v35  ;;  %v65_v10 = vld [vmem:[%s6383_s2 + $0xb0] sm:$0xff]  ;;  %v70_v35 = vld [vmem:[%s6383_s2 + $0xd8] sm:$0xff]  ;;  %v3859_v13 = vcombine.low %v94_v60, %v98_v63 }
  0x2c   :  { %v3825_v24 = vcombine.low %v61_v9, %v65_v10  ;;  %v3836_v46 = vcombine.high %v70_v35, %v74_v39 }
  0x2e   :  { %894 = vmatpush1.bf16.msra.mxu0 %v3885_v16  ;;  %947 = vmatpush1.bf16.msra.mxu1 %v3887_v40  ;;  %v3826_v16 = vcombine.high %v61_v9, %v65_v10  ;;  %v125_v10 = vld [vmem:[%s6383_s2 + $0x290] sm:$0xff] }
  0x2f   :  { %895 = vmatprep.subr.bf16.mxu0 %v3894_v18  ;;  %948 = vmatprep.subr.bf16.mxu1 %v3896_v43  ;;  %v54_v18 = vld [vmem:[%s6383_s2 + $0x58] sm:$0xff] }
  0x30   :  { %v3820_v30 = vcombine.high %v54_v18, %v58_v23  ;;  %v3819_v34 = vcombine.low %v54_v18, %v58_v23  ;;  %v78_v43 = vld [vmem:[%s6383_s2 + $0x118] sm:$0xff] }
  0x31   :  { %v3844_v54 = vcombine.high %v78_v43, %v82_v47 }
  0x32   :  { %896 = vmatpush1.bf16.msra.mxu0 %v3893_v25  ;;  %949 = vmatpush1.bf16.msra.mxu1 %v3895_v48  ;;  %v3834_v25 = vcombine.high %v69_v19, %v73_v20  ;;  %v133_v19 = vld [vmem:[%s6383_s2 + $0x2d0] sm:$0xff] }
  0x33   :  { %897 = vmatprep.subr.bf16.mxu0 %v3902_v28  ;;  %950 = vmatprep.subr.bf16.mxu1 %v3904_v50  ;;  %v77_v28 = vld [vmem:[%s6383_s2 + $0x110] sm:$0xff]  ;;  %v3835_v50 = vcombine.low %v70_v35, %v74_v39 }
  0x34   :  { %v3841_v40 = vcombine.low %v77_v28, %v81_v29  ;;  %v137_v20 = vld [vmem:[%s6383_s2 + $0x2f0] sm:$0xff] }
  0x35   :  { %v3897_v35 = vcombine.low %v133_v19, %v137_v20 }
  0x36   :  { %898 = vmatpush1.bf16.msra.mxu0 %v3901_v33  ;;  %951 = vmatpush1.bf16.msra.mxu1 %v3903_v56  ;;  %v3842_v33 = vcombine.high %v77_v28, %v81_v29  ;;  %v141_v28 = vld [vmem:[%s6383_s2 + $0x310] sm:$0xff] }
  0x37   :  { %899 = vmatprep.subr.bf16.mxu0 %v3910_v37  ;;  %952 = vmatprep.subr.bf16.mxu1 %v3912_v58  ;;  %v89_v37 = vld [vmem:[%s6383_s2 + $0x170] sm:$0xff]  ;;  %v3843_v58 = vcombine.low %v78_v43, %v82_v47 }
  0x38   :  { %v3849_v48 = vcombine.low %v85_v36, %v89_v37  ;;  %v145_v29 = vld [vmem:[%s6383_s2 + $0x330] sm:$0xff] }
  0x39   :  { %v3905_v43 = vcombine.low %v141_v28, %v145_v29 }
  0x3a   :  { %900 = vmatpush1.bf16.msra.mxu0 %v3909_v41  ;;  %953 = vmatpush1.bf16.msra.mxu1 %v3911_v0  ;;  %v3850_v41 = vcombine.high %v85_v36, %v89_v37  ;;  %v149_v36 = vld [vmem:[%s6383_s2 + $0x350] sm:$0xff] }
  0x3b   :  { %901 = vmatprep.subr.bf16.mxu0 %v3918_v44  ;;  %954 = vmatprep.subr.bf16.mxu1 %v3920_v3  ;;  %v93_v44 = vld [vmem:[%s6383_s2 + $0x190] sm:$0xff]  ;;  %v3851_v3 = vcombine.low %v86_v51, %v90_v55 }
  0x3c   :  { %v3857_v56 = vcombine.low %v93_v44, %v97_v45  ;;  %v153_v37 = vld [vmem:[%s6383_s2 + $0x370] sm:$0xff] }
  0x3e   :  { %902 = vmatpush1.bf16.msra.mxu0 %v3917_v49  ;;  %955 = vmatpush1.bf16.msra.mxu1 %v3919_v8  ;;  %v3858_v49 = vcombine.high %v93_v44, %v97_v45  ;;  %v106_v8 = vld [vmem:[%s6383_s2 + $0x1f8] sm:$0xff]  ;;  %v157_v44 = vld [vmem:[%s6383_s2 + $0x390] sm:$0xff] }
  0x3f   :  { %903 = vmatprep.subr.bf16.mxu0 %v3926_v52  ;;  %956 = vmatprep.subr.bf16.mxu1 %v3928_v11  ;;  %v101_v52 = vld [vmem:[%s6383_s2 + $0x1d0] sm:$0xff]  ;;  %v3867_v23 = vcombine.low %v102_v4, %v106_v8 }
  0x40   :  { %v3865_v0 = vcombine.low %v101_v52, %v105_v53  ;;  %v129_v11 = vld [vmem:[%s6383_s2 + $0x2b0] sm:$0xff] }
  0x41   :  { %v3889_v27 = vcombine.low %v125_v10, %v129_v11  ;;  %v161_v45 = vld [vmem:[%s6383_s2 + $0x3b0] sm:$0xff] }
  0x42   :  { %904 = vmatpush1.bf16.msra.mxu0 %v3925_v57  ;;  %957 = vmatpush1.bf16.msra.mxu1 %v3927_v17  ;;  %v3866_v57 = vcombine.high %v101_v52, %v105_v53  ;;  %v114_v17 = vld [vmem:[%s6383_s2 + $0x238] sm:$0xff]  ;;  %v165_v52 = vld [vmem:[%s6383_s2 + $0x3d0] sm:$0xff] }
  0x43   :  { %979 = vmatprep.subr.bf16.mxu0 %v3810_v62  ;;  %1032 = vmatprep.subr.bf16.mxu1 %v3812_v21  ;;  %v3852_v62 = vcombine.high %v86_v51, %v90_v55  ;;  %v3890_v21 = vcombine.high %v125_v10, %v129_v11  ;;  %v3913_v51 = vcombine.low %v149_v36, %v153_v37  ;;  %v169_v53 = vld [vmem:[%s6383_s2 + $0x3f0] sm:$0xff] }
  0x44   :  { %v4412_v11 = vld [vmem:[%s6387_s4 + $0x20] ss:$16 sps:$4 sm:$0xff]  }
  0x45   :  { %906 = vmatmul.mubr.bf16.vlgmr.msra.gmra.mrb[0].mxu0 %v5087_v59  ;;  %959 = vmatmul.mubr.bf16.vlgmr.msra.gmra.mrb[0].mxu1 %v5087_v59 }
  0x46   :  { %915 = vmatprep.mubr.bf16.mxu0 %v5104_v2  ;;  %980 = vmatpush1.bf16.msra.mxu0 %v3809_v6  ;;  %v121_v6 = vld [vmem:[%s6383_s2 + $0x270] sm:$0xff] }
  0x47   :  { %981 = vmatprep.subr.bf16.mxu0 %v3818_v7  ;;  %1033 = vmatpush1.bf16.msra.mxu1 %v3811_v26  ;;  %v3860_v7 = vcombine.high %v94_v60, %v98_v63  ;;  %v3882_v12 = vcombine.high %v117_v5, %v121_v6  ;;  %v3881_v18 = vcombine.low %v117_v5, %v121_v6  ;;  %v162_v63 = vld [vmem:[%s6383_s2 + $0x3b8] sm:$0xff] }
  0x48   :  { %968 = vmatprep.mubr.bf16.mxu1 %v5104_v2  ;;  %1034 = vmatprep.subr.bf16.mxu1 %v3820_v30  ;;  %v3898_v30 = vcombine.high %v133_v19, %v137_v20  ;;  %v3921_v60 = vcombine.low %v157_v44, %v161_v45  ;;  %v166_v5 = vld [vmem:[%s6383_s2 + $0x3d8] sm:$0xff]  ;;  %v4398_v19 = vld [vmem:[%s6385_s5] ss:$16 sps:$4 sm:$0xff]  }
  0x49   :  { %v170_v6 = vld [vmem:[%s6383_s2 + $0x3f8] sm:$0xff] }
  0x4a   :  { %982 = vmatpush1.bf16.msra.mxu0 %v3817_v15  ;;  %v110_v15 = vld [vmem:[%s6383_s2 + $0x218] sm:$0xff] }
  0x4b   :  { %983 = vmatprep.subr.bf16.mxu0 %v3826_v16  ;;  %1035 = vmatpush1.bf16.msra.mxu1 %v3819_v34  ;;  %v3868_v16 = vcombine.high %v102_v4, %v106_v8  ;;  %v3876_v26 = vcombine.high %v110_v15, %v114_v17  ;;  %v3875_v31 = vcombine.low %v110_v15, %v114_v17  ;;  %v4400_v15 = vld [vmem:[%s6385_s5 + $0x4] ss:$16 sps:$4 sm:$0xff]   ;;  %v4418_v17 = vld [vmem:[%s6387_s4 + $0x40] ss:$16 sps:$4 sm:$0xff]   ;;  %v4404_v20 = vld [vmem:[%s6385_s5 + $0xc] ss:$16 sps:$4 sm:$0xff]  }
  0x4c   :  { %1036 = vmatprep.subr.bf16.mxu1 %v3828_v38  ;;  %v3906_v38 = vcombine.high %v141_v28, %v145_v29  ;;  %v4401_v28 = vld [vmem:[%s6386_s1] sm:$0xff]   ;;  %v4402_v29 = vld [vmem:[%s6385_s5 + $0x8] ss:$16 sps:$4 sm:$0xff]  }
  0x4d   :  { %916 = vmatmul.mubr.bf16.gmra.mrb[4].mxu0 %v5129_v14  ;;  %969 = vmatmul.mubr.bf16.gmra.mrb[4].mxu1 %v5129_v14 }
  0x4e   :  { %1011 = vmatprep.mubr.bf16.mxu0 %v4930_v22  ;;  %984 = vmatpush1.bf16.msra.mxu0 %v3825_v24  ;;  %v118_v24 = vld [vmem:[%s6383_s2 + $0x258] sm:$0xff] }
  0x4f   :  { %985 = vmatprep.subr.bf16.mxu0 %v3834_v25  ;;  %1037 = vmatpush1.bf16.msra.mxu1 %v3827_v42  ;;  %v122_v25 = vld [vmem:[%s6383_s2 + $0x278] sm:$0xff] }
  0x50   :  { %1064 = vmatprep.mubr.bf16.mxu1 %v4930_v22  ;;  %1038 = vmatprep.subr.bf16.mxu1 %v3836_v46  ;;  %v109_v22 = vld [vmem:[%s6383_s2 + $0x210] sm:$0xff]  ;;  %v3884_v34 = vcombine.high %v118_v24, %v122_v25  ;;  %v3883_v39 = vcombine.low %v118_v24, %v122_v25  ;;  %v3914_v46 = vcombine.high %v149_v36, %v153_v37 }
  0x51   :  { %v3874_v1 = vcombine.high %v109_v22, %v113_v61  ;;  %v3873_v9 = vcombine.low %v109_v22, %v113_v61  ;;  %v3930_v22 = vcombine.high %v165_v52, %v169_v53  ;;  %v4430_v24 = vld [vmem:[%s6387_s4 + $0x80] ss:$16 sps:$4 sm:$0xff]   ;;  %v4438_v25 = vld [vmem:[%s6387_s4 + $0xa4] ss:$16 sps:$4 sm:$0xff]  }
  0x52   :  { %986 = vmatpush1.bf16.msra.mxu0 %v3833_v32  ;;  %v126_v32 = vld [vmem:[%s6383_s2 + $0x298] sm:$0xff]  ;;  %v4460_v36 = vld [vmem:[%s6387_s4 + $0x120] ss:$16 sps:$4 sm:$0xff]   ;;  %v4468_v37 = vld [vmem:[%s6387_s4 + $0x144] ss:$16 sps:$4 sm:$0xff]  }
  0x53   :  { %987 = vmatprep.subr.bf16.mxu0 %v3842_v33  ;;  %1039 = vmatpush1.bf16.msra.mxu1 %v3835_v50  ;;  %v130_v33 = vld [vmem:[%s6383_s2 + $0x2b8] sm:$0xff] }
  0x54   :  { %1040 = vmatprep.subr.bf16.mxu1 %v3844_v54  ;;  %v3892_v42 = vcombine.high %v126_v32, %v130_v33  ;;  %v3891_v47 = vcombine.low %v126_v32, %v130_v33  ;;  %v3922_v54 = vcombine.high %v157_v44, %v161_v45  ;;  %v4456_v32 = vld [vmem:[%s6387_s4 + $0x104] ss:$16 sps:$4 sm:$0xff]   ;;  %v4454_v33 = vld [vmem:[%s6387_s4 + $0x100] ss:$16 sps:$4 sm:$0xff]   ;;  %v4415_v44 = vld [vmem:[%s6387_s4 + $0x28] ss:$16 sps:$4 sm:$0xff]  }
  0x55   :  { %v4423_v45 = vld [vmem:[%s6387_s4 + $0x4c] ss:$16 sps:$4 sm:$0xff]  }
  0x56   :  { %988 = vmatpush1.bf16.msra.mxu0 %v3841_v40  ;;  %v134_v40 = vld [vmem:[%s6383_s2 + $0x2d8] sm:$0xff] }
  0x57   :  { %989 = vmatprep.subr.bf16.mxu0 %v3850_v41  ;;  %1041 = vmatpush1.bf16.msra.mxu1 %v3843_v58  ;;  %v138_v41 = vld [vmem:[%s6383_s2 + $0x2f8] sm:$0xff] }
  0x58   :  { %1042 = vmatprep.subr.bf16.mxu1 %v3852_v62  ;;  %v3900_v50 = vcombine.high %v134_v40, %v138_v41  ;;  %v3899_v55 = vcombine.low %v134_v40, %v138_v41  ;;  %v158_v62 = vld [vmem:[%s6383_s2 + $0x398] sm:$0xff] }
  0x59   :  { %v3924_v8 = vcombine.high %v158_v62, %v162_v63  ;;  %v3923_v10 = vcombine.low %v158_v62, %v162_v63  ;;  %v4409_v40 = vld [vmem:[%s6387_s4 + $0x8] ss:$16 sps:$4 sm:$0xff]   ;;  %v4417_v41 = vld [vmem:[%s6387_s4 + $0x2c] ss:$16 sps:$4 sm:$0xff]  }
  0x5a   :  { %990 = vmatpush1.bf16.msra.mxu0 %v3849_v48  ;;  %v142_v48 = vld [vmem:[%s6383_s2 + $0x318] sm:$0xff] }
  0x5b   :  { %991 = vmatprep.subr.bf16.mxu0 %v3858_v49  ;;  %1043 = vmatpush1.bf16.msra.mxu1 %v3851_v3  ;;  %v146_v49 = vld [vmem:[%s6383_s2 + $0x338] sm:$0xff]  ;;  %v3929_v3 = vcombine.low %v165_v52, %v169_v53 }
  0x5c   :  { %1044 = vmatprep.subr.bf16.mxu1 %v3860_v7  ;;  %v3908_v58 = vcombine.high %v142_v48, %v146_v49  ;;  %v3907_v61 = vcombine.low %v142_v48, %v146_v49  ;;  %v4406_v7 = vld [vmem:[%s6387_s4] ss:$16 sps:$4 sm:$0xff]   ;;  %v4421_v48 = vld [vmem:[%s6387_s4 + $0x48] ss:$16 sps:$4 sm:$0xff]   ;;  %v4429_v49 = vld [vmem:[%s6387_s4 + $0x6c] ss:$16 sps:$4 sm:$0xff]  }
  0x5d   :  { %v4427_v52 = vld [vmem:[%s6387_s4 + $0x68] ss:$16 sps:$4 sm:$0xff]   ;;  %v4435_v53 = vld [vmem:[%s6387_s4 + $0x8c] ss:$16 sps:$4 sm:$0xff]  }
  0x5e   :  { %992 = vmatpush1.bf16.msra.mxu0 %v3857_v56  ;;  %v150_v56 = vld [vmem:[%s6383_s2 + $0x358] sm:$0xff] }
  0x5f   :  { %993 = vmatprep.subr.bf16.mxu0 %v3866_v57  ;;  %1045 = vmatpush1.bf16.msra.mxu1 %v3859_v13  ;;  %v154_v57 = vld [vmem:[%s6383_s2 + $0x378] sm:$0xff]  ;;  %v4420_v13 = vld [vmem:[%s6387_s4 + $0x44] ss:$16 sps:$4 sm:$0xff]  }
  0x60   :  { %1046 = vmatprep.subr.bf16.mxu1 %v3868_v16  ;;  %v3915_v4 = vcombine.low %v150_v56, %v154_v57  ;;  %v3931_v16 = vcombine.low %v166_v5, %v170_v6  ;;  %v4445_v62 = vld [vmem:[%s6387_s4 + $0xc8] ss:$16 sps:$4 sm:$0xff]   ;;  %v4453_v63 = vld [vmem:[%s6387_s4 + $0xec] ss:$16 sps:$4 sm:$0xff]  }
  0x62   :  { %994 = vmatpush1.bf16.msra.mxu0 %v3865_v0  ;;  %v3916_v0 = vcombine.high %v150_v56, %v154_v57  ;;  %v4433_v56 = vld [vmem:[%s6387_s4 + $0x88] ss:$16 sps:$4 sm:$0xff]   ;;  %v4441_v57 = vld [vmem:[%s6387_s4 + $0xac] ss:$16 sps:$4 sm:$0xff]  }
  0x63   :  { %995 = vmatprep.subr.bf16.mxu0 %v3874_v1  ;;  %1047 = vmatpush1.bf16.msra.mxu1 %v3867_v23  ;;  %v4408_v1 = vld [vmem:[%s6387_s4 + $0x4] ss:$16 sps:$4 sm:$0xff]  }
  0x64   :  { %1048 = vmatprep.subr.bf16.mxu1 %v3876_v26  ;;  %v4432_v23 = vld [vmem:[%s6387_s4 + $0x84] ss:$16 sps:$4 sm:$0xff]   ;;  %v4436_v26 = vld [vmem:[%s6387_s4 + $0xa0] ss:$16 sps:$4 sm:$0xff]  }
  0x66   :  { %996 = vmatpush1.bf16.msra.mxu0 %v3873_v9  ;;  %v4414_v9 = vld [vmem:[%s6387_s4 + $0x24] ss:$16 sps:$4 sm:$0xff]  }
  0x67   :  { %997 = vmatprep.subr.bf16.mxu0 %v3882_v12  ;;  %1049 = vmatpush1.bf16.msra.mxu1 %v3875_v31  ;;  %v3932_v12 = vcombine.high %v166_v5, %v170_v6  ;;  %v4448_v31 = vld [vmem:[%s6387_s4 + $0xe0] ss:$16 sps:$4 sm:$0xff]   ;;  %v4463_v5 = vld [vmem:[%s6387_s4 + $0x128] ss:$16 sps:$4 sm:$0xff]   ;;  %v4471_v6 = vld [vmem:[%s6387_s4 + $0x14c] ss:$16 sps:$4 sm:$0xff]  }
  0x68   :  { %1050 = vmatprep.subr.bf16.mxu1 %v3884_v34  ;;  %v4405_v34 = vld [vmem:[%s6386_s1 + $0x8] sm:$0xff]  }
  0x6a   :  { %998 = vmatpush1.bf16.msra.mxu0 %v3881_v18  ;;  %v4426_v18 = vld [vmem:[%s6387_s4 + $0x64] ss:$16 sps:$4 sm:$0xff]  }
  0x6b   :  { %999 = vmatprep.subr.bf16.mxu0 %v3890_v21  ;;  %1051 = vmatpush1.bf16.msra.mxu1 %v3883_v39  ;;  %v4424_v21 = vld [vmem:[%s6387_s4 + $0x60] ss:$16 sps:$4 sm:$0xff]   ;;  %v4474_v39 = vld [vmem:[%s6387_s4 + $0x164] ss:$16 sps:$4 sm:$0xff]  }
  0x6c   :  { %1052 = vmatprep.subr.bf16.mxu1 %v3892_v42  ;;  %v4472_v42 = vld [vmem:[%s6387_s4 + $0x160] ss:$16 sps:$4 sm:$0xff]  }
  0x6e   :  { %1000 = vmatpush1.bf16.msra.mxu0 %v3889_v27  ;;  %v4442_v27 = vld [vmem:[%s6387_s4 + $0xc0] ss:$16 sps:$4 sm:$0xff]  }
  0x6f   :  { %1001 = vmatprep.subr.bf16.mxu0 %v3898_v30  ;;  %1053 = vmatpush1.bf16.msra.mxu1 %v3891_v47  ;;  %v4411_v30 = vld [vmem:[%s6387_s4 + $0xc] ss:$16 sps:$4 sm:$0xff]   ;;  %v4486_v47 = vld [vmem:[%s6387_s4 + $0x1a4] ss:$16 sps:$4 sm:$0xff]  }
  0x70   :  { %1054 = vmatprep.subr.bf16.mxu1 %v3900_v50  ;;  %v4484_v50 = vld [vmem:[%s6387_s4 + $0x1a0] ss:$16 sps:$4 sm:$0xff]  }
  0x72   :  { %1002 = vmatpush1.bf16.msra.mxu0 %v3897_v35  ;;  %v4462_v35 = vld [vmem:[%s6387_s4 + $0x124] ss:$16 sps:$4 sm:$0xff]  }
  0x73   :  { %1003 = vmatprep.subr.bf16.mxu0 %v3906_v38  ;;  %1055 = vmatpush1.bf16.msra.mxu1 %v3899_v55  ;;  %v4466_v38 = vld [vmem:[%s6387_s4 + $0x140] ss:$16 sps:$4 sm:$0xff]   ;;  %v4498_v55 = vld [vmem:[%s6387_s4 + $0x1e4] ss:$16 sps:$4 sm:$0xff]  }
  0x74   :  { %1056 = vmatprep.subr.bf16.mxu1 %v3908_v58  ;;  %v4496_v58 = vld [vmem:[%s6387_s4 + $0x1e0] ss:$16 sps:$4 sm:$0xff]  }
  0x76   :  { %1004 = vmatpush1.bf16.msra.mxu0 %v3905_v43  ;;  %v4480_v43 = vld [vmem:[%s6387_s4 + $0x184] ss:$16 sps:$4 sm:$0xff]  }
  0x77   :  { %1005 = vmatprep.subr.bf16.mxu0 %v3914_v46  ;;  %1057 = vmatpush1.bf16.msra.mxu1 %v3907_v61  ;;  %v4478_v46 = vld [vmem:[%s6387_s4 + $0x180] ss:$16 sps:$4 sm:$0xff]   ;;  %v4447_v61 = vld [vmem:[%s6387_s4 + $0xcc] ss:$16 sps:$4 sm:$0xff]  }
  0x78   :  { %1058 = vmatprep.subr.bf16.mxu1 %v3916_v0  ;;  %v4451_v0 = vld [vmem:[%s6387_s4 + $0xe8] ss:$16 sps:$4 sm:$0xff]  }
  0x7a   :  { %1006 = vmatpush1.bf16.msra.mxu0 %v3913_v51  ;;  %v4492_v51 = vld [vmem:[%s6387_s4 + $0x1c4] ss:$16 sps:$4 sm:$0xff]  }
  0x7b   :  { %1007 = vmatprep.subr.bf16.mxu0 %v3922_v54  ;;  %1059 = vmatpush1.bf16.msra.mxu1 %v3915_v4  ;;  %v4490_v54 = vld [vmem:[%s6387_s4 + $0x1c0] ss:$16 sps:$4 sm:$0xff]   ;;  %v4465_v4 = vld [vmem:[%s6387_s4 + $0x12c] ss:$16 sps:$4 sm:$0xff]  }
  0x7c   :  { %1060 = vmatprep.subr.bf16.mxu1 %v3924_v8  ;;  %v4477_v8 = vld [vmem:[%s6387_s4 + $0x16c] ss:$16 sps:$4 sm:$0xff]  }
  0x7e   :  { %1008 = vmatpush1.bf16.msra.mxu0 %v3921_v60  ;;  %v4504_v60 = vld [vmem:[%s6387_s4 + $0x204] ss:$16 sps:$4 sm:$0xff]  }
  0x7f   :  { %1009 = vmatprep.subr.bf16.mxu0 %v3930_v22  ;;  %1061 = vmatpush1.bf16.msra.mxu1 %v3923_v10  ;;  %v4439_v22 = vld [vmem:[%s6387_s4 + $0xa8] ss:$16 sps:$4 sm:$0xff]   ;;  %v4483_v10 = vld [vmem:[%s6387_s4 + $0x18c] ss:$16 sps:$4 sm:$0xff]  }
  0x80   :  { %1062 = vmatprep.subr.bf16.mxu1 %v3932_v12  ;;  %v4489_v12 = vld [vmem:[%s6387_s4 + $0x1ac] ss:$16 sps:$4 sm:$0xff]  }
  0x82   :  { %1010 = vmatpush1.bf16.msra.mxu0 %v3929_v3  ;;  %v4457_v3 = vld [vmem:[%s6387_s4 + $0x108] ss:$16 sps:$4 sm:$0xff]  }
  0x83   :  { %2820 = vmatprep.subr.bf16.mxu0 %v4408_v1  ;;  %1063 = vmatpush1.bf16.msra.mxu1 %v3931_v16  ;;  %v4459_v1 = vld [vmem:[%s6387_s4 + $0x10c] ss:$16 sps:$4 sm:$0xff]   ;;  %v4493_v16 = vld [vmem:[%s6387_s4 + $0x1c8] ss:$16 sps:$4 sm:$0xff]  }
  0x84   :  { %1434 = vmatprep.subr.bf16.mxu1 %v4400_v15  ;;  %v4495_v15 = vld [vmem:[%s6387_s4 + $0x1cc] ss:$16 sps:$4 sm:$0xff]  }
  0x85   :  { %1012 = vmatmul.mubr.bf16.vlgmr.msra.gmra.mrb[8].mxu0 %v5087_v59 }
  0x86   :  { %1021 = vmatprep.mubr.bf16.mxu0 %v5104_v2  ;;  %2821 = vmatpush1.bf16.msra.mxu0 %v4406_v7  ;;  %v4469_v7 = vld [vmem:[%s6387_s4 + $0x148] ss:$16 sps:$4 sm:$0xff]  }
  0x87   :  { %2822 = vmatprep.subr.bf16.mxu0 %v4414_v9  ;;  %1065 = vmatmul.mubr.bf16.vlgmr.msra.gmra.mrb[8].mxu1 %v5087_v59  ;;  %v4444_v59 = vld [vmem:[%s6387_s4 + $0xc4] ss:$16 sps:$4 sm:$0xff]   ;;  %v4475_v9 = vld [vmem:[%s6387_s4 + $0x168] ss:$16 sps:$4 sm:$0xff]  }
  0x88   :  { %1435 = vmatpush1.bf16.msra.mxu1 %v4398_v19  ;;  %1074 = vmatprep.mubr.bf16.mxu1 %v5104_v2  ;;  %v4830_v2 = vmov 0   ;;  %v4507_v19 = vld [vmem:[%s6387_s4 + $0x20c] ss:$16 sps:$4 sm:$0xff]  }
  0x89   :  { %1487 = vmatprep.subr.bf16.mxu1 %v4404_v20  ;;  %v173_v20 = vlaneseq }
  0x8a   :  { %2823 = vmatpush1.bf16.msra.mxu0 %v4412_v11  ;;  %v4481_v11 = vld [vmem:[%s6387_s4 + $0x188] ss:$16 sps:$4 sm:$0xff]  }
  0x8b   :  { %2824 = vmatprep.subr.bf16.mxu0 %v4420_v13  ;;  %v4487_v13 = vld [vmem:[%s6387_s4 + $0x1a8] ss:$16 sps:$4 sm:$0xff]  }
  0x8d   :  { %1022 = vmatmul.mubr.bf16.gmra.mrb[12].mxu0 %v5129_v14 }
  0x8e   :  { %2825 = vmatpush1.bf16.msra.mxu0 %v4418_v17  ;;  %v4501_v17 = vld [vmem:[%s6387_s4 + $0x1ec] ss:$16 sps:$4 sm:$0xff]  }
  0x8f   :  { %2826 = vmatprep.subr.bf16.mxu0 %v4426_v18  ;;  %1075 = vmatmul.mubr.bf16.gmra.mrb[12].mxu1 %v5129_v14  ;;  %v4450_v14 = vld [vmem:[%s6387_s4 + $0xe4] ss:$16 sps:$4 sm:$0xff]   ;;  %v4499_v18 = vld [vmem:[%s6387_s4 + $0x1e8] ss:$16 sps:$4 sm:$0xff]  }
  0x90   :  { %1466 = vmatprep.mubr.bf16.mxu1 %v4830_v2 }
  0x92   :  { %2827 = vmatpush1.bf16.msra.mxu0 %v4424_v21  ;;  %v5531_v21 = vshrl.u32 %v173_v20, 7 }
  0x93   :  { %2828 = vmatprep.subr.bf16.mxu0 %v4432_v23 }
  0x94   :  { %v175_v23 = vsub.s32 0, %v5531_v21 }
  0x96   :  { %2829 = vmatpush1.bf16.msra.mxu0 %v4430_v24  ;;  %v5537_v24 = vld [vmem:[%s6388_s3] sm:$0xff] }
  0x97   :  { %2830 = vmatprep.subr.bf16.mxu0 %v4438_v25  ;;  %3939 = vmatmul.mubr.msk.bf16.vlgmr.msra.gmra.mrb[16].mxu1 %vm1427_vm0, %v4401_v28  ;;  %v179_v25 = vsub.s32 1, %v5531_v21 }
  0x98   :  { %1488 = vmatpush1.bf16.msra.mxu1 %v4402_v29  ;;  %1476 = vmatprep.mubr.bf16.mxu1 %v4830_v2 }
  0x99   :  { %3032 = vmatprep.subr.bf16.mxu1 %v4411_v30 }
  0x9a   :  { %2831 = vmatpush1.bf16.msra.mxu0 %v4436_v26  ;;  %v176_v26 = vrot.slane %v5537_v24, %v175_v23 }
  0x9b   :  { %2832 = vmatprep.subr.bf16.mxu0 %v4444_v59  ;;  %v180_v59 = vrot.slane %v5537_v24, %v179_v25 }
  0x9e   :  { %2833 = vmatpush1.bf16.msra.mxu0 %v4442_v27 }
  0x9f   :  { %2834 = vmatprep.subr.bf16.mxu0 %v4450_v14  ;;  %3940 = vmatmul.mubr.msk.bf16.gmra.mrb[20].mxu1 %vm1427_vm0, %v4405_v34 }
  0xa0   :  { %1519 = vmatprep.mubr.bf16.mxu1 %v4830_v2 }
  0xa2   :  { %2835 = vmatpush1.bf16.msra.mxu0 %v4448_v31 }
  0xa3   :  { %2836 = vmatprep.subr.bf16.mxu0 %v4456_v32 }
  0xa6   :  { %2837 = vmatpush1.bf16.msra.mxu0 %v4454_v33  ;;  %v183_v33 = vsub.s32 2, %v5531_v21 }
  0xa7   :  { %2838 = vmatprep.subr.bf16.mxu0 %v4462_v35  ;;  %3941 = vmatmul.mubr.msk.bf16.vlgmr.msra.gmra.mrb[24].mxu1 %vm1427_vm0, %v4401_v28 }
  0xa8   :  { %3033 = vmatpush1.bf16.msra.mxu1 %v4409_v40  ;;  %1529 = vmatprep.mubr.bf16.mxu1 %v4830_v2 }
  0xa9   :  { %3034 = vmatprep.subr.bf16.mxu1 %v4417_v41  ;;  %v4502_v41 = vld [vmem:[%s6387_s4 + $0x200] ss:$16 sps:$4 sm:$0xff]  }
  0xaa   :  { %2839 = vmatpush1.bf16.msra.mxu0 %v4460_v36  ;;  %v187_v36 = vsub.s32 3, %v5531_v21 }
  0xab   :  { %2840 = vmatprep.subr.bf16.mxu0 %v4468_v37 }
  0xac   :  { %3035 = vmatpush1.bf16.msra.mxu1 %v4415_v44  ;;  %v5557_v44 = vrot.slane %v5537_v24, %v183_v33 }
  0xad   :  { %3036 = vmatprep.subr.bf16.mxu1 %v4423_v45  ;;  %v4510_v45 = vld [vmem:[%s6387_s4 + $0x224] ss:$16 sps:$4 sm:$0xff]  }
  0xae   :  { %2841 = vmatpush1.bf16.msra.mxu0 %v4466_v38 }
  0xaf   :  { %2842 = vmatprep.subr.bf16.mxu0 %v4474_v39  ;;  %3942 = vmatmul.mubr.msk.bf16.gmra.mrb[28].mxu1 %vm1427_vm0, %v4405_v34 }
  0xb0   :  { %3037 = vmatpush1.bf16.msra.mxu1 %v4421_v48 }
  0xb1   :  { %3038 = vmatprep.subr.bf16.mxu1 %v4429_v49  ;;  %v5568_v49 = vrot.slane %v5537_v24, %v187_v36 }
  0xb2   :  { %2843 = vmatpush1.bf16.msra.mxu0 %v4472_v42  ;;  %v4505_v42 = vld [vmem:[%s6387_s4 + $0x208] ss:$16 sps:$4 sm:$0xff]  }
  0xb3   :  { %2844 = vmatprep.subr.bf16.mxu0 %v4480_v43 }
  0xb4   :  { %3039 = vmatpush1.bf16.msra.mxu1 %v4427_v52 }
  0xb5   :  { %3040 = vmatprep.subr.bf16.mxu1 %v4435_v53 }
  0xb6   :  { %2845 = vmatpush1.bf16.msra.mxu0 %v4478_v46  ;;  %v4513_v46 = vld [vmem:[%s6387_s4 + $0x22c] ss:$16 sps:$4 sm:$0xff]  }
  0xb7   :  { %2846 = vmatprep.subr.bf16.mxu0 %v4486_v47 }
  0xb8   :  { %3041 = vmatpush1.bf16.msra.mxu1 %v4433_v56  ;;  %v4508_v56 = vld [vmem:[%s6387_s4 + $0x220] ss:$16 sps:$4 sm:$0xff]  }
  0xb9   :  { %3042 = vmatprep.subr.bf16.mxu1 %v4441_v57  ;;  %v4511_v57 = vld [vmem:[%s6387_s4 + $0x228] ss:$16 sps:$4 sm:$0xff]  }
  0xba   :  { %2847 = vmatpush1.bf16.msra.mxu0 %v4484_v50 }
  0xbb   :  { %2848 = vmatprep.subr.bf16.mxu0 %v4492_v51 }
  0xbc   :  { %3043 = vmatpush1.bf16.msra.mxu1 %v4439_v22 }
  0xbd   :  { %3044 = vmatprep.subr.bf16.mxu1 %v4447_v61 }
  0xbe   :  { %2849 = vmatpush1.bf16.msra.mxu0 %v4490_v54 }
  0xbf   :  { %2850 = vmatprep.subr.bf16.mxu0 %v4498_v55 }
  0xc0   :  { %3045 = vmatpush1.bf16.msra.mxu1 %v4445_v62  ;;  %v4516_v62 = vld [vmem:[%s6387_s4 + $0x244] ss:$16 sps:$4 sm:$0xff]  }
  0xc1   :  { %3046 = vmatprep.subr.bf16.mxu1 %v4453_v63  ;;  %v4519_v63 = vld [vmem:[%s6387_s4 + $0x24c] ss:$16 sps:$4 sm:$0xff]  }
  0xc2   :  { %2851 = vmatpush1.bf16.msra.mxu0 %v4496_v58 }
  0xc3   :  { %2873 = vmatprep.subr.bf16.mxu0 %v4504_v60 }
  0xc4   :  { %3047 = vmatpush1.bf16.msra.mxu1 %v4451_v0 }
  0xc5   :  { %3048 = vmatprep.subr.bf16.mxu1 %v4459_v1 }
  0xc8   :  { %3049 = vmatpush1.bf16.msra.mxu1 %v4457_v3 }
  0xc9   :  { %3050 = vmatprep.subr.bf16.mxu1 %v4465_v4 }
  0xcc   :  { %3051 = vmatpush1.bf16.msra.mxu1 %v4463_v5 }
  0xcd   :  { %3052 = vmatprep.subr.bf16.mxu1 %v4471_v6 }
  0xd0   :  { %3053 = vmatpush1.bf16.msra.mxu1 %v4469_v7 }
  0xd1   :  { %3054 = vmatprep.subr.bf16.mxu1 %v4477_v8 }
  0xd4   :  { %3055 = vmatpush1.bf16.msra.mxu1 %v4475_v9 }
  0xd5   :  { %3056 = vmatprep.subr.bf16.mxu1 %v4483_v10 }
  0xd8   :  { %3057 = vmatpush1.bf16.msra.mxu1 %v4481_v11  ;;  %v4514_v11 = vld [vmem:[%s6387_s4 + $0x240] ss:$16 sps:$4 sm:$0xff]  }
  0xd9   :  { %3058 = vmatprep.subr.bf16.mxu1 %v4489_v12  ;;  %v4517_v12 = vld [vmem:[%s6387_s4 + $0x248] ss:$16 sps:$4 sm:$0xff]  }
  0xdc   :  { %3059 = vmatpush1.bf16.msra.mxu1 %v4487_v13 }
  0xdd   :  { %3060 = vmatprep.subr.bf16.mxu1 %v4495_v15 }
  0xe0   :  { %3061 = vmatpush1.bf16.msra.mxu1 %v4493_v16  ;;  %v4522_v16 = vld [vmem:[%s6387_s4 + $0x264] ss:$16 sps:$4 sm:$0xff]  }
  0xe1   :  { %3062 = vmatprep.subr.bf16.mxu1 %v4501_v17  ;;  %v4525_v17 = vld [vmem:[%s6387_s4 + $0x26c] ss:$16 sps:$4 sm:$0xff]  }
  0xe4   :  { %3063 = vmatpush1.bf16.msra.mxu1 %v4499_v18 }
  0xe5   :  { %3085 = vmatprep.subr.bf16.mxu1 %v4507_v19 }
 0x118   :  { %v907_v2 = vpop.f32.mrb[0].mxu0  ;;  %v960_v55 = vpop.f32.mrb[0].mxu1 }
 0x119   :  { %v908_v27 = vadd.f32 %v907_v2, %v176_v26  ;;  %v909_v28 = vpop.f32.mrb[1].mxu0  ;;  %v961_v22 = vadd.f32 %v960_v55, %v5557_v44  ;;  %v962_v61 = vpop.f32.mrb[1].mxu1  ;;  %v4523_v2 = vld [vmem:[%s6387_s4 + $0x268] ss:$16 sps:$4 sm:$0xff]   ;;  %v4544_v55 = vld [vmem:[%s6387_s4 + $0x2e0] ss:$16 sps:$4 sm:$0xff]  }
 0x11a   :  { %v910_v14 = vadd.f32 %v909_v28, %v180_v59  ;;  %v911_v29 = vpop.f32.mrb[2].mxu0  ;;  %v963_v1 = vadd.f32 %v962_v61, %v5568_v49  ;;  %v964_v3 = vpop.f32.mrb[2].mxu1  ;;  %v4558_v61 = vld [vmem:[%s6387_s4 + $0x324] ss:$16 sps:$4 sm:$0xff]  }
 0x11b   :  { %v912_v30 = vadd.f32 %v911_v29, %v176_v26  ;;  %v913_v31 = vpop.f32.mrb[3].mxu0  ;;  %v1085_v34 = vmax.f32 %v908_v27, 0.0  ;;  %v1087_v5 = vmax.f32 %v961_v22, 0.0  ;;  %v965_v6 = vadd.f32 %v964_v3, %v5557_v44  ;;  %v966_v7 = vpop.f32.mrb[3].mxu1  ;;  %v4531_v29 = vld [vmem:[%s6387_s4 + $0x28c] ss:$16 sps:$4 sm:$0xff]  }
 0x11c   :  { %v914_v32 = vadd.f32 %v913_v31, %v180_v59  ;;  %v1086_v37 = vmax.f32 %v910_v14, 0.0  ;;  %v1088_v9 = vmax.f32 %v963_v1, 0.0  ;;  %v967_v10 = vadd.f32 %v966_v7, %v5568_v49  ;;  %v4528_v14 = vld [vmem:[%s6387_s4 + $0x284] ss:$16 sps:$4 sm:$0xff]   ;;  %v4553_v22 = vld [vmem:[%s6387_s4 + $0x308] ss:$16 sps:$4 sm:$0xff]  }
 0x11d   :  { %v1093_v35 = vmax.f32 %v912_v30, 0.0  ;;  %v1095_v15 = vmax.f32 %v965_v6, 0.0  ;;  %v4564_v1 = vld [vmem:[%s6387_s4 + $0x344] ss:$16 sps:$4 sm:$0xff]   ;;  %v4567_v3 = vld [vmem:[%s6387_s4 + $0x34c] ss:$16 sps:$4 sm:$0xff]  }
 0x11e   :  { %v1094_v38 = vmax.f32 %v914_v32, 0.0  ;;  %v1096_v18 = vmax.f32 %v967_v10, 0.0  ;;  %v4570_v6 = vld [vmem:[%s6387_s4 + $0x364] ss:$16 sps:$4 sm:$0xff]   ;;  %v4573_v7 = vld [vmem:[%s6387_s4 + $0x36c] ss:$16 sps:$4 sm:$0xff]  }
 0x11f   :  { %v1117_v39 = vpack.c.bf16 %v1093_v35, %v1085_v34  ;;  %v5598_v19 = vpack.c.bf16 %v1095_v15, %v1087_v5  ;;  %v4565_v5 = vld [vmem:[%s6387_s4 + $0x348] ss:$16 sps:$4 sm:$0xff]   ;;  %v4576_v10 = vld [vmem:[%s6387_s4 + $0x384] ss:$16 sps:$4 sm:$0xff]  }
 0x120   :  { %v1118_v40 = vpack.c.bf16 %v1094_v38, %v1086_v37  ;;  %v917_v43 = vpop.f32.mrb[4].mxu0  ;;  %v1120_v20 = vpack.c.bf16 %v1096_v18, %v1088_v9  ;;  %v4571_v9 = vld [vmem:[%s6387_s4 + $0x368] ss:$16 sps:$4 sm:$0xff]   ;;  %v4582_v15 = vld [vmem:[%s6387_s4 + $0x3a4] ss:$16 sps:$4 sm:$0xff]   ;;  %v195_v18 = vsub.s32 5, %v5531_v21 }
 0x121   :  { %v918_v47 = vadd.f32 %v917_v43, %v176_v26  ;;  %v919_v48 = vpop.f32.mrb[5].mxu0  ;;  %v4537_v43 = vld [vmem:[%s6387_s4 + $0x2ac] ss:$16 sps:$4 sm:$0xff]  }
 0x122   :  { %2852 = vmatprep.mubr.bf16.mxu0 %v1118_v40  ;;  %3064 = vmatprep.mubr.bf16.mxu1 %v1118_v40  ;;  %v920_v50 = vadd.f32 %v919_v48, %v180_v59  ;;  %v921_v51 = vpop.f32.mrb[6].mxu0  ;;  %v4529_v40 = vld [vmem:[%s6387_s4 + $0x288] ss:$16 sps:$4 sm:$0xff]  }
 0x123   :  { %2853 = vmatmul.mubr.bf16.vlgmr.msra.gmra.mrb[16].mxu0 %v1117_v39  ;;  %3065 = vmatmul.mubr.bf16.vlgmr.msra.gmra.mrb[24].mxu1 %v1117_v39  ;;  %v1101_v52 = vmax.f32 %v918_v47, 0.0  ;;  %v922_v53 = vadd.f32 %v921_v51, %v176_v26  ;;  %v923_v54 = vpop.f32.mrb[7].mxu0  ;;  %v970_v26 = vpop.f32.mrb[4].mxu1  ;;  %v4526_v39 = vld [vmem:[%s6387_s4 + $0x280] ss:$16 sps:$4 sm:$0xff]  }
 0x124   :  { %2874 = vmatpush1.bf16.msra.mxu0 %v4502_v41  ;;  %3086 = vmatpush1.bf16.msra.mxu1 %v4505_v42  ;;  %v1102_v58 = vmax.f32 %v920_v50, 0.0  ;;  %v924_v60 = vadd.f32 %v923_v54, %v180_v59  ;;  %v4520_v59 = vld [vmem:[%s6387_s4 + $0x260] ss:$16 sps:$4 sm:$0xff]   ;;  %v971_v27 = vadd.f32 %v970_v26, %v5557_v44  ;;  %v972_v28 = vpop.f32.mrb[5].mxu1  ;;  %v4534_v42 = vld [vmem:[%s6387_s4 + $0x2a4] ss:$16 sps:$4 sm:$0xff]  }
 0x125   :  { %2875 = vmatprep.subr.bf16.mxu0 %v4510_v45  ;;  %3087 = vmatprep.subr.bf16.mxu1 %v4513_v46  ;;  %v1109_v0 = vmax.f32 %v922_v53, 0.0  ;;  %v973_v30 = vadd.f32 %v972_v28, %v5568_v49  ;;  %v974_v31 = vpop.f32.mrb[6].mxu1  ;;  %v4532_v47 = vld [vmem:[%s6387_s4 + $0x2a0] ss:$16 sps:$4 sm:$0xff]   ;;  %v4535_v48 = vld [vmem:[%s6387_s4 + $0x2a8] ss:$16 sps:$4 sm:$0xff]   ;;  %v5744_v28 = vrot.slane %v5537_v24, %v195_v18 }
 0x126   :  { %v1110_v4 = vmax.f32 %v924_v60, 0.0  ;;  %v1103_v32 = vmax.f32 %v971_v27, 0.0  ;;  %v975_v34 = vadd.f32 %v974_v31, %v5557_v44  ;;  %v976_v35 = vpop.f32.mrb[7].mxu1  ;;  %v4543_v50 = vld [vmem:[%s6387_s4 + $0x2cc] ss:$16 sps:$4 sm:$0xff]  }
 0x127   :  { %v1125_v8 = vpack.c.bf16 %v1109_v0, %v1101_v52  ;;  %v1104_v37 = vmax.f32 %v973_v30, 0.0  ;;  %v977_v38 = vadd.f32 %v976_v35, %v5568_v49  ;;  %v4540_v49 = vld [vmem:[%s6387_s4 + $0x2c4] ss:$16 sps:$4 sm:$0xff]   ;;  %v4538_v51 = vld [vmem:[%s6387_s4 + $0x2c0] ss:$16 sps:$4 sm:$0xff]  }
 0x128   :  { %2876 = vmatpush1.bf16.msra.mxu0 %v4508_v56  ;;  %3088 = vmatpush1.bf16.msra.mxu1 %v4511_v57  ;;  %v1126_v13 = vpack.c.bf16 %v1110_v4, %v1102_v58  ;;  %v1111_v41 = vmax.f32 %v975_v34, 0.0  ;;  %v4541_v52 = vld [vmem:[%s6387_s4 + $0x2c8] ss:$16 sps:$4 sm:$0xff]   ;;  %v4546_v53 = vld [vmem:[%s6387_s4 + $0x2e4] ss:$16 sps:$4 sm:$0xff]  }
 0x129   :  { %2877 = vmatprep.subr.bf16.mxu0 %v4516_v62  ;;  %3089 = vmatprep.subr.bf16.mxu1 %v4519_v63  ;;  %v1112_v44 = vmax.f32 %v977_v38, 0.0  ;;  %v4549_v54 = vld [vmem:[%s6387_s4 + $0x2ec] ss:$16 sps:$4 sm:$0xff]   ;;  %v4547_v56 = vld [vmem:[%s6387_s4 + $0x2e8] ss:$16 sps:$4 sm:$0xff]  }
 0x12a   :  { %2862 = vmatprep.mubr.bf16.mxu0 %v1126_v13  ;;  %3074 = vmatprep.mubr.bf16.mxu1 %v1126_v13  ;;  %v5628_v45 = vpack.c.bf16 %v1111_v41, %v1103_v32  ;;  %v4552_v57 = vld [vmem:[%s6387_s4 + $0x304] ss:$16 sps:$4 sm:$0xff]   ;;  %v4555_v58 = vld [vmem:[%s6387_s4 + $0x30c] ss:$16 sps:$4 sm:$0xff]   ;;  %v4550_v60 = vld [vmem:[%s6387_s4 + $0x300] ss:$16 sps:$4 sm:$0xff]  }
 0x12b   :  { %2863 = vmatmul.mubr.bf16.gmra.mrb[20].mxu0 %v1125_v8  ;;  %3075 = vmatmul.mubr.bf16.gmra.mrb[28].mxu1 %v1125_v8  ;;  %v5630_v46 = vpack.c.bf16 %v1112_v44, %v1104_v37  ;;  %v4561_v62 = vld [vmem:[%s6387_s4 + $0x32c] ss:$16 sps:$4 sm:$0xff]   ;;  %v4556_v63 = vld [vmem:[%s6387_s4 + $0x320] ss:$16 sps:$4 sm:$0xff]   ;;  %v4559_v0 = vld [vmem:[%s6387_s4 + $0x328] ss:$16 sps:$4 sm:$0xff]  }
 0x12c   :  { %2878 = vmatpush1.bf16.msra.mxu0 %v4514_v11  ;;  %3090 = vmatpush1.bf16.msra.mxu1 %v4517_v12  ;;  %v4562_v4 = vld [vmem:[%s6387_s4 + $0x340] ss:$16 sps:$4 sm:$0xff]   ;;  %v4579_v11 = vld [vmem:[%s6387_s4 + $0x38c] ss:$16 sps:$4 sm:$0xff]   ;;  %v4577_v13 = vld [vmem:[%s6387_s4 + $0x388] ss:$16 sps:$4 sm:$0xff]  }
 0x12d   :  { %2879 = vmatprep.subr.bf16.mxu0 %v4522_v16  ;;  %3091 = vmatprep.subr.bf16.mxu1 %v4525_v17  ;;  %v4568_v8 = vld [vmem:[%s6387_s4 + $0x360] ss:$16 sps:$4 sm:$0xff]   ;;  %v4585_v16 = vld [vmem:[%s6387_s4 + $0x3ac] ss:$16 sps:$4 sm:$0xff]   ;;  %v191_v17 = vsub.s32 4, %v5531_v21 }
 0x12e   :  { %2905 = vmatprep.mubr.bf16.mxu0 %v1120_v20  ;;  %3117 = vmatprep.mubr.bf16.mxu1 %v1120_v20  ;;  %v4574_v12 = vld [vmem:[%s6387_s4 + $0x380] ss:$16 sps:$4 sm:$0xff]   ;;  %v4583_v26 = vld [vmem:[%s6387_s4 + $0x3a8] ss:$16 sps:$4 sm:$0xff]   ;;  %v4594_v30 = vld [vmem:[%s6387_s4 + $0x3e4] ss:$16 sps:$4 sm:$0xff]  }
 0x12f   :  { %v4580_v20 = vld [vmem:[%s6387_s4 + $0x3a0] ss:$16 sps:$4 sm:$0xff]   ;;  %v192_v27 = vrot.slane %v5537_v24, %v191_v17  ;;  %v4597_v31 = vld [vmem:[%s6387_s4 + $0x3ec] ss:$16 sps:$4 sm:$0xff]  }
 0x130   :  { %2880 = vmatpush1.bf16.msra.mxu0 %v4520_v59  ;;  %3092 = vmatpush1.bf16.msra.mxu1 %v4523_v2  ;;  %v4588_v59 = vld [vmem:[%s6387_s4 + $0x3c4] ss:$16 sps:$4 sm:$0xff]   ;;  %v4591_v2 = vld [vmem:[%s6387_s4 + $0x3cc] ss:$16 sps:$4 sm:$0xff]   ;;  %v4592_v37 = vld [vmem:[%s6387_s4 + $0x3e0] ss:$16 sps:$4 sm:$0xff]  }
 0x131   :  { %2881 = vmatprep.subr.bf16.mxu0 %v4528_v14  ;;  %3093 = vmatprep.subr.bf16.mxu1 %v4531_v29  ;;  %v4586_v14 = vld [vmem:[%s6387_s4 + $0x3c0] ss:$16 sps:$4 sm:$0xff]   ;;  %v4589_v29 = vld [vmem:[%s6387_s4 + $0x3c8] ss:$16 sps:$4 sm:$0xff]  }
 0x134   :  { %2882 = vmatpush1.bf16.msra.mxu0 %v4526_v39  ;;  %3094 = vmatpush1.bf16.msra.mxu1 %v4529_v40  ;;  %v4595_v40 = vld [vmem:[%s6387_s4 + $0x3e8] ss:$16 sps:$4 sm:$0xff]  }
 0x135   :  { %2883 = vmatprep.subr.bf16.mxu0 %v4534_v42  ;;  %3095 = vmatprep.subr.bf16.mxu1 %v4537_v43  ;;  %v199_v43 = vsub.s32 6, %v5531_v21 }
 0x138   :  { %2884 = vmatpush1.bf16.msra.mxu0 %v4532_v47  ;;  %3096 = vmatpush1.bf16.msra.mxu1 %v4535_v48  ;;  %v4600_v47 = vld [vmem:[%s6387_s4 + $0x404] ss:$16 sps:$4 sm:$0xff]   ;;  %v4603_v48 = vld [vmem:[%s6387_s4 + $0x40c] ss:$16 sps:$4 sm:$0xff]  }
 0x139   :  { %2885 = vmatprep.subr.bf16.mxu0 %v4540_v49  ;;  %3097 = vmatprep.subr.bf16.mxu1 %v4543_v50 }
 0x13c   :  { %2886 = vmatpush1.bf16.msra.mxu0 %v4538_v51  ;;  %3098 = vmatpush1.bf16.msra.mxu1 %v4541_v52  ;;  %v203_v51 = vsub.s32 7, %v5531_v21 }
 0x13d   :  { %2887 = vmatprep.subr.bf16.mxu0 %v4546_v53  ;;  %3099 = vmatprep.subr.bf16.mxu1 %v4549_v54  ;;  %v4598_v54 = vld [vmem:[%s6387_s4 + $0x400] ss:$16 sps:$4 sm:$0xff]  }
 0x140   :  { %2888 = vmatpush1.bf16.msra.mxu0 %v4544_v55  ;;  %3100 = vmatpush1.bf16.msra.mxu1 %v4547_v56  ;;  %v4601_v55 = vld [vmem:[%s6387_s4 + $0x408] ss:$16 sps:$4 sm:$0xff]  }
 0x141   :  { %2889 = vmatprep.subr.bf16.mxu0 %v4552_v57  ;;  %3101 = vmatprep.subr.bf16.mxu1 %v4555_v58  ;;  %v5783_v57 = vrot.slane %v5537_v24, %v199_v43  ;;  %v4606_v58 = vld [vmem:[%s6387_s4 + $0x424] ss:$16 sps:$4 sm:$0xff]  }
 0x144   :  { %2890 = vmatpush1.bf16.msra.mxu0 %v4550_v60  ;;  %3102 = vmatpush1.bf16.msra.mxu1 %v4553_v22  ;;  %v4609_v60 = vld [vmem:[%s6387_s4 + $0x42c] ss:$16 sps:$4 sm:$0xff]  }
 0x145   :  { %2891 = vmatprep.subr.bf16.mxu0 %v4558_v61  ;;  %3103 = vmatprep.subr.bf16.mxu1 %v4561_v62  ;;  %v5794_v61 = vrot.slane %v5537_v24, %v203_v51  ;;  %v4607_v24 = vld [vmem:[%s6387_s4 + $0x428] ss:$16 sps:$4 sm:$0xff]  }
 0x148   :  { %2892 = vmatpush1.bf16.msra.mxu0 %v4556_v63  ;;  %3104 = vmatpush1.bf16.msra.mxu1 %v4559_v0 }
 0x149   :  { %2893 = vmatprep.subr.bf16.mxu0 %v4564_v1  ;;  %3105 = vmatprep.subr.bf16.mxu1 %v4567_v3  ;;  %v4604_v1 = vld [vmem:[%s6387_s4 + $0x420] ss:$16 sps:$4 sm:$0xff]  }
 0x14c   :  { %2894 = vmatpush1.bf16.msra.mxu0 %v4562_v4  ;;  %3106 = vmatpush1.bf16.msra.mxu1 %v4565_v5 }
 0x14d   :  { %2895 = vmatprep.subr.bf16.mxu0 %v4570_v6  ;;  %3107 = vmatprep.subr.bf16.mxu1 %v4573_v7 }
 0x150   :  { %2896 = vmatpush1.bf16.msra.mxu0 %v4568_v8  ;;  %3108 = vmatpush1.bf16.msra.mxu1 %v4571_v9 }
 0x151   :  { %2897 = vmatprep.subr.bf16.mxu0 %v4576_v10  ;;  %3109 = vmatprep.subr.bf16.mxu1 %v4579_v11  ;;  %v4612_v10 = vld [vmem:[%s6387_s4 + $0x444] ss:$16 sps:$4 sm:$0xff]   ;;  %v4615_v11 = vld [vmem:[%s6387_s4 + $0x44c] ss:$16 sps:$4 sm:$0xff]  }
 0x154   :  { %2898 = vmatpush1.bf16.msra.mxu0 %v4574_v12  ;;  %3110 = vmatpush1.bf16.msra.mxu1 %v4577_v13 }
 0x155   :  { %2899 = vmatprep.subr.bf16.mxu0 %v4582_v15  ;;  %3111 = vmatprep.subr.bf16.mxu1 %v4585_v16 }
 0x158   :  { %2900 = vmatpush1.bf16.msra.mxu0 %v4580_v20  ;;  %3112 = vmatpush1.bf16.msra.mxu1 %v4583_v26  ;;  %v1013_v32 = vpop.f32.mrb[8].mxu0 }
 0x159   :  { %2901 = vmatprep.subr.bf16.mxu0 %v4588_v59  ;;  %3113 = vmatprep.subr.bf16.mxu1 %v4591_v2  ;;  %v1014_v34 = vadd.f32 %v1013_v32, %v192_v27  ;;  %v1015_v35 = vpop.f32.mrb[9].mxu0 }
 0x15a   :  { %v1016_v38 = vadd.f32 %v1015_v35, %v5744_v28  ;;  %v1017_v39 = vpop.f32.mrb[10].mxu0  ;;  %v1066_v3 = vpop.f32.mrb[8].mxu1 }
 0x15b   :  { %v1089_v41 = vmax.f32 %v1014_v34, 0.0  ;;  %v1018_v42 = vadd.f32 %v1017_v39, %v192_v27  ;;  %v1019_v44 = vpop.f32.mrb[11].mxu0  ;;  %v1067_v6 = vadd.f32 %v1066_v3, %v5783_v57  ;;  %v1068_v7 = vpop.f32.mrb[9].mxu1 }
 0x15c   :  { %2902 = vmatpush1.bf16.msra.mxu0 %v4586_v14  ;;  %3114 = vmatpush1.bf16.msra.mxu1 %v4589_v29  ;;  %v1090_v49 = vmax.f32 %v1016_v38, 0.0  ;;  %v1020_v50 = vadd.f32 %v1019_v44, %v5744_v28  ;;  %v1069_v12 = vadd.f32 %v1068_v7, %v5794_v61  ;;  %v1070_v13 = vpop.f32.mrb[10].mxu1  ;;  %v4610_v14 = vld [vmem:[%s6387_s4 + $0x440] ss:$16 sps:$4 sm:$0xff]   ;;  %v4619_v38 = vld [vmem:[%s6387_s4 + $0x468] ss:$16 sps:$4 sm:$0xff]  }
 0x15d   :  { %2903 = vmatprep.subr.bf16.mxu0 %v4594_v30  ;;  %3115 = vmatprep.subr.bf16.mxu1 %v4597_v31  ;;  %v1097_v52 = vmax.f32 %v1018_v42, 0.0  ;;  %v1091_v17 = vmax.f32 %v1067_v6, 0.0  ;;  %v1071_v18 = vadd.f32 %v1070_v13, %v5783_v57  ;;  %v1072_v20 = vpop.f32.mrb[11].mxu1  ;;  %v4618_v30 = vld [vmem:[%s6387_s4 + $0x464] ss:$16 sps:$4 sm:$0xff]  }
 0x15e   :  { %v1098_v53 = vmax.f32 %v1020_v50, 0.0  ;;  %v1092_v59 = vmax.f32 %v1069_v12, 0.0  ;;  %v1073_v2 = vadd.f32 %v1072_v20, %v5794_v61  ;;  %v4621_v31 = vld [vmem:[%s6387_s4 + $0x46c] ss:$16 sps:$4 sm:$0xff]   ;;  %v4637_v7 = vld [vmem:[%s6387_s4 + $0x4c8] ss:$16 sps:$4 sm:$0xff]  }
 0x15f   :  { %v5780_v56 = vpack.c.bf16 %v1097_v52, %v1089_v41  ;;  %v4624_v41 = vld [vmem:[%s6387_s4 + $0x484] ss:$16 sps:$4 sm:$0xff]   ;;  %v4627_v42 = vld [vmem:[%s6387_s4 + $0x48c] ss:$16 sps:$4 sm:$0xff]   ;;  %v4649_v20 = vld [vmem:[%s6387_s4 + $0x508] ss:$16 sps:$4 sm:$0xff]  }
 0x160   :  { %2904 = vmatpush1.bf16.msra.mxu0 %v4592_v37  ;;  %3116 = vmatpush1.bf16.msra.mxu1 %v4595_v40  ;;  %v5791_v22 = vpack.c.bf16 %v1098_v53, %v1090_v49  ;;  %v1023_v62 = vpop.f32.mrb[12].mxu0  ;;  %v1100_v32 = vmax.f32 %v1073_v2, 0.0  ;;  %v4616_v37 = vld [vmem:[%s6387_s4 + $0x460] ss:$16 sps:$4 sm:$0xff]   ;;  %v4625_v49 = vld [vmem:[%s6387_s4 + $0x488] ss:$16 sps:$4 sm:$0xff]  }
 0x161   :  { %2926 = vmatprep.subr.bf16.mxu0 %v4600_v47  ;;  %3138 = vmatprep.subr.bf16.mxu1 %v4603_v48  ;;  %v1024_v63 = vadd.f32 %v1023_v62, %v192_v27  ;;  %v1025_v0 = vpop.f32.mrb[13].mxu0  ;;  %v4622_v48 = vld [vmem:[%s6387_s4 + $0x480] ss:$16 sps:$4 sm:$0xff]   ;;  %v4630_v53 = vld [vmem:[%s6387_s4 + $0x4a4] ss:$16 sps:$4 sm:$0xff]  }
 0x162   :  { %v1026_v4 = vadd.f32 %v1025_v0, %v5744_v28  ;;  %v1027_v5 = vpop.f32.mrb[14].mxu0  ;;  %v5844_v39 = vpack.c.bf16 %v1100_v32, %v1092_v59  ;;  %v1076_v40 = vpop.f32.mrb[12].mxu1  ;;  %v4631_v62 = vld [vmem:[%s6387_s4 + $0x4a8] ss:$16 sps:$4 sm:$0xff]   ;;  %v4639_v0 = vld [vmem:[%s6387_s4 + $0x4cc] ss:$16 sps:$4 sm:$0xff]  }
 0x163   :  { %2906 = vmatmul.mubr.bf16.vlgmr.msra.gmra.mrb[16].mxu0 %v5598_v19  ;;  %3118 = vmatmul.mubr.bf16.vlgmr.msra.gmra.mrb[24].mxu1 %v5598_v19  ;;  %v1105_v8 = vmax.f32 %v1024_v63, 0.0  ;;  %v1028_v9 = vadd.f32 %v1027_v5, %v192_v27  ;;  %v1029_v19 = vpop.f32.mrb[15].mxu0  ;;  %v1077_v43 = vadd.f32 %v1076_v40, %v5783_v57  ;;  %v1078_v44 = vpop.f32.mrb[13].mxu1  ;;  %v4651_v12 = vld [vmem:[%s6387_s4 + $0x50c] ss:$16 sps:$4 sm:$0xff]  }
 0x164   :  { %2927 = vmatpush1.bf16.msra.mxu0 %v4598_v54  ;;  %3139 = vmatpush1.bf16.msra.mxu1 %v4601_v55  ;;  %v1106_v15 = vmax.f32 %v1026_v4, 0.0  ;;  %v1030_v16 = vadd.f32 %v1029_v19, %v5744_v28  ;;  %v4613_v28 = vld [vmem:[%s6387_s4 + $0x448] ss:$16 sps:$4 sm:$0xff]   ;;  %v1080_v47 = vpop.f32.mrb[14].mxu1  ;;  %v4633_v54 = vld [vmem:[%s6387_s4 + $0x4ac] ss:$16 sps:$4 sm:$0xff]  }
 0x165   :  { %2928 = vmatprep.subr.bf16.mxu0 %v4606_v58  ;;  %3140 = vmatprep.subr.bf16.mxu1 %v4609_v60  ;;  %v1113_v26 = vmax.f32 %v1028_v9, 0.0  ;;  %v1107_v50 = vmax.f32 %v1077_v43, 0.0  ;;  %v1081_v51 = vadd.f32 %v1080_v47, %v5783_v57  ;;  %v1082_v52 = vpop.f32.mrb[15].mxu1  ;;  %v4628_v57 = vld [vmem:[%s6387_s4 + $0x4a0] ss:$16 sps:$4 sm:$0xff]  }
 0x166   :  { %2915 = vmatprep.mubr.bf16.mxu0 %v5630_v46  ;;  %3127 = vmatprep.mubr.bf16.mxu1 %v5630_v46  ;;  %v1114_v27 = vmax.f32 %v1030_v16, 0.0  ;;  %v1099_v46 = vmax.f32 %v1071_v18, 0.0  ;;  %v1083_v58 = vadd.f32 %v1082_v52, %v5794_v61  ;;  %v4645_v9 = vld [vmem:[%s6387_s4 + $0x4ec] ss:$16 sps:$4 sm:$0xff]   ;;  %v4640_v19 = vld [vmem:[%s6387_s4 + $0x4e0] ss:$16 sps:$4 sm:$0xff]  }
 0x167   :  { %v5824_v29 = vpack.c.bf16 %v1113_v26, %v1105_v8  ;;  %v1115_v60 = vmax.f32 %v1081_v51, 0.0  ;;  %v4642_v8 = vld [vmem:[%s6387_s4 + $0x4e4] ss:$16 sps:$4 sm:$0xff]   ;;  %v4657_v59 = vld [vmem:[%s6387_s4 + $0x52c] ss:$16 sps:$4 sm:$0xff]  }
 0x168   :  { %2929 = vmatpush1.bf16.msra.mxu0 %v4604_v1  ;;  %3141 = vmatpush1.bf16.msra.mxu1 %v4607_v24  ;;  %v5832_v34 = vpack.c.bf16 %v1114_v27, %v1106_v15  ;;  %v5834_v35 = vpack.c.bf16 %v1099_v46, %v1091_v17  ;;  %v4634_v24 = vld [vmem:[%s6387_s4 + $0x4c0] ss:$16 sps:$4 sm:$0xff]   ;;  %v4654_v26 = vld [vmem:[%s6387_s4 + $0x524] ss:$16 sps:$4 sm:$0xff]   ;;  %v4655_v27 = vld [vmem:[%s6387_s4 + $0x528] ss:$16 sps:$4 sm:$0xff]  }
 0x169   :  { %2930 = vmatprep.subr.bf16.mxu0 %v4612_v10  ;;  %3142 = vmatprep.subr.bf16.mxu1 %v4615_v11  ;;  %v5876_v63 = vpack.c.bf16 %v1115_v60, %v1107_v50  ;;  %v4643_v10 = vld [vmem:[%s6387_s4 + $0x4e8] ss:$16 sps:$4 sm:$0xff]   ;;  %v4648_v11 = vld [vmem:[%s6387_s4 + $0x504] ss:$16 sps:$4 sm:$0xff]   ;;  %v4646_v17 = vld [vmem:[%s6387_s4 + $0x500] ss:$16 sps:$4 sm:$0xff]  }
 0x16a   :  { %v5886_v3 = vpop.f32.mrb[16].mxu1  ;;  %v4652_v2 = vld [vmem:[%s6387_s4 + $0x520] ss:$16 sps:$4 sm:$0xff]   ;;  %v4669_v32 = vld [vmem:[%s6387_s4 + $0x56c] ss:$16 sps:$4 sm:$0xff]  }
 0x16b   :  { %2916 = vmatmul.mubr.bf16.gmra.mrb[20].mxu0 %v5628_v45  ;;  %3128 = vmatmul.mubr.bf16.gmra.mrb[28].mxu1 %v5628_v45  ;;  %v1079_v45 = vadd.f32 %v1078_v44, %v5794_v61  ;;  %v4636_v61 = vld [vmem:[%s6387_s4 + $0x4c4] ss:$16 sps:$4 sm:$0xff]   ;;  %v5888_v4 = vpop.f32.mrb[17].mxu1  ;;  %v4658_v46 = vld [vmem:[%s6387_s4 + $0x540] ss:$16 sps:$4 sm:$0xff]  }
 0x16c   :  { %2931 = vmatpush1.bf16.msra.mxu0 %v4610_v14  ;;  %3143 = vmatpush1.bf16.msra.mxu1 %v4613_v28  ;;  %v5890_v5 = vpop.f32.mrb[18].mxu1  ;;  %v4660_v14 = vld [vmem:[%s6387_s4 + $0x544] ss:$16 sps:$4 sm:$0xff]   ;;  %v4663_v28 = vld [vmem:[%s6387_s4 + $0x54c] ss:$16 sps:$4 sm:$0xff]  }
 0x16d   :  { %2932 = vmatprep.subr.bf16.mxu0 %v4618_v30  ;;  %3144 = vmatprep.subr.bf16.mxu1 %v4621_v31  ;;  %v1108_v55 = vmax.f32 %v1079_v45, 0.0  ;;  %v5895_v6 = vpop.f32.mrb[19].mxu1  ;;  %v4661_v30 = vld [vmem:[%s6387_s4 + $0x548] ss:$16 sps:$4 sm:$0xff]   ;;  %v4666_v31 = vld [vmem:[%s6387_s4 + $0x564] ss:$16 sps:$4 sm:$0xff]  }
 0x16e   :  { %2958 = vmatprep.mubr.bf16.mxu0 %v5791_v22  ;;  %3170 = vmatprep.mubr.bf16.mxu1 %v5791_v22  ;;  %v1116_v22 = vmax.f32 %v1083_v58, 0.0  ;;  %v4672_v40 = vld [vmem:[%s6387_s4 + $0x584] ss:$16 sps:$4 sm:$0xff]   ;;  %v4673_v43 = vld [vmem:[%s6387_s4 + $0x588] ss:$16 sps:$4 sm:$0xff]  }
 0x16f   :  { %v4678_v44 = vld [vmem:[%s6387_s4 + $0x5a4] ss:$16 sps:$4 sm:$0xff]   ;;  %v4681_v45 = vld [vmem:[%s6387_s4 + $0x5ac] ss:$16 sps:$4 sm:$0xff]   ;;  %v4676_v47 = vld [vmem:[%s6387_s4 + $0x5a0] ss:$16 sps:$4 sm:$0xff]  }
 0x170   :  { %2933 = vmatpush1.bf16.msra.mxu0 %v4616_v37  ;;  %3145 = vmatpush1.bf16.msra.mxu1 %v4619_v38  ;;  %v5884_v1 = vpack.c.bf16 %v1116_v22, %v1108_v55  ;;  %v4664_v37 = vld [vmem:[%s6387_s4 + $0x560] ss:$16 sps:$4 sm:$0xff]   ;;  %v4667_v38 = vld [vmem:[%s6387_s4 + $0x568] ss:$16 sps:$4 sm:$0xff]   ;;  %v4687_v50 = vld [vmem:[%s6387_s4 + $0x5cc] ss:$16 sps:$4 sm:$0xff]  }
 0x171   :  { %2934 = vmatprep.subr.bf16.mxu0 %v4624_v41  ;;  %3146 = vmatprep.subr.bf16.mxu1 %v4627_v42  ;;  %v4675_v41 = vld [vmem:[%s6387_s4 + $0x58c] ss:$16 sps:$4 sm:$0xff]   ;;  %v4670_v42 = vld [vmem:[%s6387_s4 + $0x580] ss:$16 sps:$4 sm:$0xff]   ;;  %v4685_v52 = vld [vmem:[%s6387_s4 + $0x5c8] ss:$16 sps:$4 sm:$0xff]  }
 0x172   :  { %v5918_v13 = vpop.f32.mrb[20].mxu1  ;;  %v4682_v51 = vld [vmem:[%s6387_s4 + $0x5c0] ss:$16 sps:$4 sm:$0xff]   ;;  %v4691_v58 = vld [vmem:[%s6387_s4 + $0x5e8] ss:$16 sps:$4 sm:$0xff]  }
 0x173   :  { %v5920_v15 = vpop.f32.mrb[21].mxu1  ;;  %v4688_v55 = vld [vmem:[%s6387_s4 + $0x5e0] ss:$16 sps:$4 sm:$0xff]   ;;  %v4696_v60 = vld [vmem:[%s6387_s4 + $0x604] ss:$16 sps:$4 sm:$0xff]  }
 0x174   :  { %2935 = vmatpush1.bf16.msra.mxu0 %v4622_v48  ;;  %3147 = vmatpush1.bf16.msra.mxu1 %v4625_v49  ;;  %v5922_v16 = vpop.f32.mrb[22].mxu1  ;;  %v4679_v48 = vld [vmem:[%s6387_s4 + $0x5a8] ss:$16 sps:$4 sm:$0xff]   ;;  %v4684_v49 = vld [vmem:[%s6387_s4 + $0x5c4] ss:$16 sps:$4 sm:$0xff]  }
 0x175   :  { %2936 = vmatprep.subr.bf16.mxu0 %v4630_v53  ;;  %3148 = vmatprep.subr.bf16.mxu1 %v4633_v54  ;;  %v5927_v18 = vpop.f32.mrb[23].mxu1  ;;  %v4690_v53 = vld [vmem:[%s6387_s4 + $0x5e4] ss:$16 sps:$4 sm:$0xff]   ;;  %v4693_v54 = vld [vmem:[%s6387_s4 + $0x5ec] ss:$16 sps:$4 sm:$0xff]  }
 0x176   :  { %v4699_v22 = vld [vmem:[%s6387_s4 + $0x60c] ss:$16 sps:$4 sm:$0xff]  }
 0x178   :  { %2937 = vmatpush1.bf16.msra.mxu0 %v4628_v57  ;;  %3149 = vmatpush1.bf16.msra.mxu1 %v4631_v62  ;;  %v4694_v57 = vld [vmem:[%s6387_s4 + $0x600] ss:$16 sps:$4 sm:$0xff]   ;;  %v4697_v62 = vld [vmem:[%s6387_s4 + $0x608] ss:$16 sps:$4 sm:$0xff]  }
 0x179   :  { %2938 = vmatprep.subr.bf16.mxu0 %v4636_v61  ;;  %3150 = vmatprep.subr.bf16.mxu1 %v4639_v0  ;;  %v4702_v61 = vld [vmem:[%s6387_s4 + $0x624] ss:$16 sps:$4 sm:$0xff]   ;;  %v4705_v0 = vld [vmem:[%s6387_s4 + $0x62c] ss:$16 sps:$4 sm:$0xff]  }
 0x17c   :  { %2939 = vmatpush1.bf16.msra.mxu0 %v4634_v24  ;;  %3151 = vmatpush1.bf16.msra.mxu1 %v4637_v7  ;;  %v4700_v24 = vld [vmem:[%s6387_s4 + $0x620] ss:$16 sps:$4 sm:$0xff]   ;;  %v4703_v7 = vld [vmem:[%s6387_s4 + $0x628] ss:$16 sps:$4 sm:$0xff]  }
 0x17d   :  { %2940 = vmatprep.subr.bf16.mxu0 %v4642_v8  ;;  %3152 = vmatprep.subr.bf16.mxu1 %v4645_v9  ;;  %v4708_v8 = vld [vmem:[%s6387_s4 + $0x644] ss:$16 sps:$4 sm:$0xff]   ;;  %v4706_v9 = vld [vmem:[%s6387_s4 + $0x640] ss:$16 sps:$4 sm:$0xff]  }
 0x180   :  { %2941 = vmatpush1.bf16.msra.mxu0 %v4640_v19  ;;  %3153 = vmatpush1.bf16.msra.mxu1 %v4643_v10  ;;  %v4709_v19 = vld [vmem:[%s6387_s4 + $0x648] ss:$16 sps:$4 sm:$0xff]   ;;  %v4714_v10 = vld [vmem:[%s6387_s4 + $0x664] ss:$16 sps:$4 sm:$0xff]  }
 0x181   :  { %2942 = vmatprep.subr.bf16.mxu0 %v4648_v11  ;;  %3154 = vmatprep.subr.bf16.mxu1 %v4651_v12  ;;  %v4712_v11 = vld [vmem:[%s6387_s4 + $0x660] ss:$16 sps:$4 sm:$0xff]   ;;  %v4715_v12 = vld [vmem:[%s6387_s4 + $0x668] ss:$16 sps:$4 sm:$0xff]  }
 0x184   :  { %2943 = vmatpush1.bf16.msra.mxu0 %v4646_v17  ;;  %3155 = vmatpush1.bf16.msra.mxu1 %v4649_v20  ;;  %v4720_v17 = vld [vmem:[%s6387_s4 + $0x684] ss:$16 sps:$4 sm:$0xff]   ;;  %v4718_v20 = vld [vmem:[%s6387_s4 + $0x680] ss:$16 sps:$4 sm:$0xff]  }
 0x185   :  { %2944 = vmatprep.subr.bf16.mxu0 %v4654_v26  ;;  %3156 = vmatprep.subr.bf16.mxu1 %v4657_v59  ;;  %v4726_v26 = vld [vmem:[%s6387_s4 + $0x6a4] ss:$16 sps:$4 sm:$0xff]   ;;  %v4729_v59 = vld [vmem:[%s6387_s4 + $0x6ac] ss:$16 sps:$4 sm:$0xff]  }
 0x188   :  { %2945 = vmatpush1.bf16.msra.mxu0 %v4652_v2  ;;  %3157 = vmatpush1.bf16.msra.mxu1 %v4655_v27  ;;  %v4724_v2 = vld [vmem:[%s6387_s4 + $0x6a0] ss:$16 sps:$4 sm:$0xff]   ;;  %v4727_v27 = vld [vmem:[%s6387_s4 + $0x6a8] ss:$16 sps:$4 sm:$0xff]  }
 0x189   :  { %2946 = vmatprep.subr.bf16.mxu0 %v4660_v14  ;;  %3158 = vmatprep.subr.bf16.mxu1 %v4663_v28  ;;  %v4732_v14 = vld [vmem:[%s6387_s4 + $0x6c4] ss:$16 sps:$4 sm:$0xff]   ;;  %v4735_v28 = vld [vmem:[%s6387_s4 + $0x6cc] ss:$16 sps:$4 sm:$0xff]  }
 0x18c   :  { %2947 = vmatpush1.bf16.msra.mxu0 %v4658_v46  ;;  %3159 = vmatpush1.bf16.msra.mxu1 %v4661_v30  ;;  %v4730_v46 = vld [vmem:[%s6387_s4 + $0x6c0] ss:$16 sps:$4 sm:$0xff]   ;;  %v4733_v30 = vld [vmem:[%s6387_s4 + $0x6c8] ss:$16 sps:$4 sm:$0xff]  }
 0x18d   :  { %2948 = vmatprep.subr.bf16.mxu0 %v4666_v31  ;;  %3160 = vmatprep.subr.bf16.mxu1 %v4669_v32  ;;  %v4738_v31 = vld [vmem:[%s6387_s4 + $0x6e4] ss:$16 sps:$4 sm:$0xff]   ;;  %v4741_v32 = vld [vmem:[%s6387_s4 + $0x6ec] ss:$16 sps:$4 sm:$0xff]  }
 0x190   :  { %2949 = vmatpush1.bf16.msra.mxu0 %v4664_v37  ;;  %3161 = vmatpush1.bf16.msra.mxu1 %v4667_v38  ;;  %v4736_v37 = vld [vmem:[%s6387_s4 + $0x6e0] ss:$16 sps:$4 sm:$0xff]   ;;  %v4739_v38 = vld [vmem:[%s6387_s4 + $0x6e8] ss:$16 sps:$4 sm:$0xff]  }
 0x191   :  { %2950 = vmatprep.subr.bf16.mxu0 %v4672_v40  ;;  %3162 = vmatprep.subr.bf16.mxu1 %v4675_v41  ;;  %v4744_v40 = vld [vmem:[%s6387_s4 + $0x704] ss:$16 sps:$4 sm:$0xff]   ;;  %v4747_v41 = vld [vmem:[%s6387_s4 + $0x70c] ss:$16 sps:$4 sm:$0xff]  }
 0x194   :  { %2951 = vmatpush1.bf16.msra.mxu0 %v4670_v42  ;;  %3163 = vmatpush1.bf16.msra.mxu1 %v4673_v43  ;;  %v4742_v42 = vld [vmem:[%s6387_s4 + $0x700] ss:$16 sps:$4 sm:$0xff]   ;;  %v4745_v43 = vld [vmem:[%s6387_s4 + $0x708] ss:$16 sps:$4 sm:$0xff]  }
 0x195   :  { %2952 = vmatprep.subr.bf16.mxu0 %v4678_v44  ;;  %3164 = vmatprep.subr.bf16.mxu1 %v4681_v45  ;;  %v4750_v44 = vld [vmem:[%s6387_s4 + $0x724] ss:$16 sps:$4 sm:$0xff]   ;;  %v4753_v45 = vld [vmem:[%s6387_s4 + $0x72c] ss:$16 sps:$4 sm:$0xff]  }
 0x198   :  { %2953 = vmatpush1.bf16.msra.mxu0 %v4676_v47  ;;  %3165 = vmatpush1.bf16.msra.mxu1 %v4679_v48  ;;  %v4748_v47 = vld [vmem:[%s6387_s4 + $0x720] ss:$16 sps:$4 sm:$0xff]   ;;  %v4751_v48 = vld [vmem:[%s6387_s4 + $0x728] ss:$16 sps:$4 sm:$0xff]  }
 0x199   :  { %2954 = vmatprep.subr.bf16.mxu0 %v4684_v49  ;;  %3166 = vmatprep.subr.bf16.mxu1 %v4687_v50  ;;  %v4756_v49 = vld [vmem:[%s6387_s4 + $0x744] ss:$16 sps:$4 sm:$0xff]   ;;  %v4759_v50 = vld [vmem:[%s6387_s4 + $0x74c] ss:$16 sps:$4 sm:$0xff]  }
 0x19c   :  { %2955 = vmatpush1.bf16.msra.mxu0 %v4682_v51  ;;  %3167 = vmatpush1.bf16.msra.mxu1 %v4685_v52  ;;  %v4754_v51 = vld [vmem:[%s6387_s4 + $0x740] ss:$16 sps:$4 sm:$0xff]   ;;  %v4757_v52 = vld [vmem:[%s6387_s4 + $0x748] ss:$16 sps:$4 sm:$0xff]  }
 0x19d   :  { %2956 = vmatprep.subr.bf16.mxu0 %v4690_v53  ;;  %3168 = vmatprep.subr.bf16.mxu1 %v4693_v54  ;;  %v4762_v53 = vld [vmem:[%s6387_s4 + $0x764] ss:$16 sps:$4 sm:$0xff]   ;;  %v4765_v54 = vld [vmem:[%s6387_s4 + $0x76c] ss:$16 sps:$4 sm:$0xff]  }
 0x1a0   :  { %2957 = vmatpush1.bf16.msra.mxu0 %v4688_v55  ;;  %3169 = vmatpush1.bf16.msra.mxu1 %v4691_v58  ;;  %v4760_v55 = vld [vmem:[%s6387_s4 + $0x760] ss:$16 sps:$4 sm:$0xff]   ;;  %v4763_v58 = vld [vmem:[%s6387_s4 + $0x768] ss:$16 sps:$4 sm:$0xff]  }
 0x1a1   :  { %2979 = vmatprep.subr.bf16.mxu0 %v4696_v60  ;;  %3191 = vmatprep.subr.bf16.mxu1 %v4699_v22  ;;  %v4768_v60 = vld [vmem:[%s6387_s4 + $0x784] ss:$16 sps:$4 sm:$0xff]   ;;  %v4771_v22 = vld [vmem:[%s6387_s4 + $0x78c] ss:$16 sps:$4 sm:$0xff]  }
 0x1a3   :  { %2959 = vmatmul.mubr.bf16.vlgmr.msra.gmra.mrb[16].mxu0 %v5780_v56  ;;  %3171 = vmatmul.mubr.bf16.vlgmr.msra.gmra.mrb[24].mxu1 %v5780_v56  ;;  %v4711_v56 = vld [vmem:[%s6387_s4 + $0x64c] ss:$16 sps:$4 sm:$0xff]  }
 0x1a4   :  { %2980 = vmatpush1.bf16.msra.mxu0 %v4694_v57  ;;  %3192 = vmatpush1.bf16.msra.mxu1 %v4697_v62  ;;  %v4766_v57 = vld [vmem:[%s6387_s4 + $0x780] ss:$16 sps:$4 sm:$0xff]   ;;  %v4769_v62 = vld [vmem:[%s6387_s4 + $0x788] ss:$16 sps:$4 sm:$0xff]  }
 0x1a5   :  { %2981 = vmatprep.subr.bf16.mxu0 %v4702_v61  ;;  %3193 = vmatprep.subr.bf16.mxu1 %v4705_v0  ;;  %v4774_v61 = vld [vmem:[%s6387_s4 + $0x7a4] ss:$16 sps:$4 sm:$0xff]   ;;  %v4777_v0 = vld [vmem:[%s6387_s4 + $0x7ac] ss:$16 sps:$4 sm:$0xff]  }
 0x1a6   :  { %2968 = vmatprep.mubr.bf16.mxu0 %v5832_v34  ;;  %3180 = vmatprep.mubr.bf16.mxu1 %v5832_v34  ;;  %v4717_v34 = vld [vmem:[%s6387_s4 + $0x66c] ss:$16 sps:$4 sm:$0xff]  }
 0x1a8   :  { %2982 = vmatpush1.bf16.msra.mxu0 %v4700_v24  ;;  %3194 = vmatpush1.bf16.msra.mxu1 %v4703_v7  ;;  %v4772_v24 = vld [vmem:[%s6387_s4 + $0x7a0] ss:$16 sps:$4 sm:$0xff]   ;;  %v4775_v7 = vld [vmem:[%s6387_s4 + $0x7a8] ss:$16 sps:$4 sm:$0xff]  }
 0x1a9   :  { %2983 = vmatprep.subr.bf16.mxu0 %v4708_v8  ;;  %3195 = vmatprep.subr.bf16.mxu1 %v4711_v56  ;;  %v4780_v8 = vld [vmem:[%s6387_s4 + $0x7c4] ss:$16 sps:$4 sm:$0xff]   ;;  %v4783_v56 = vld [vmem:[%s6387_s4 + $0x7cc] ss:$16 sps:$4 sm:$0xff]  }
 0x1ab   :  { %2969 = vmatmul.mubr.bf16.gmra.mrb[20].mxu0 %v5824_v29  ;;  %3181 = vmatmul.mubr.bf16.gmra.mrb[28].mxu1 %v5824_v29  ;;  %v4723_v29 = vld [vmem:[%s6387_s4 + $0x68c] ss:$16 sps:$4 sm:$0xff]  }
 0x1ac   :  { %2984 = vmatpush1.bf16.msra.mxu0 %v4706_v9  ;;  %3011 = vmatprep.mubr.bf16.mxu0 %v5844_v39  ;;  %v4778_v9 = vld [vmem:[%s6387_s4 + $0x7c0] ss:$16 sps:$4 sm:$0xff]  }
 0x1ad   :  { %3196 = vmatpush1.bf16.msra.mxu1 %v4709_v19  ;;  %3223 = vmatprep.mubr.bf16.mxu1 %v5844_v39  ;;  %v4721_v39 = vld [vmem:[%s6387_s4 + $0x688] ss:$16 sps:$4 sm:$0xff]  }
 0x1ae   :  { %2985 = vmatprep.subr.bf16.mxu0 %v4714_v10  ;;  %3197 = vmatprep.subr.bf16.mxu1 %v4717_v34  ;;  %v4781_v19 = vld [vmem:[%s6387_s4 + $0x7c8] ss:$16 sps:$4 sm:$0xff]   ;;  %v4786_v10 = vld [vmem:[%s6387_s4 + $0x7e4] ss:$16 sps:$4 sm:$0xff]   ;;  %v4789_v34 = vld [vmem:[%s6387_s4 + $0x7ec] ss:$16 sps:$4 sm:$0xff]  }
 0x1b0   :  { %2986 = vmatpush1.bf16.msra.mxu0 %v4712_v11  ;;  %v4784_v11 = vld [vmem:[%s6387_s4 + $0x7e0] ss:$16 sps:$4 sm:$0xff]  }
 0x1b1   :  { %3198 = vmatpush1.bf16.msra.mxu1 %v4715_v12  ;;  %2987 = vmatprep.subr.bf16.mxu0 %v4720_v17  ;;  %v4787_v12 = vld [vmem:[%s6387_s4 + $0x7e8] ss:$16 sps:$4 sm:$0xff]   ;;  %v4792_v17 = vld [vmem:[%s6389_s7 + $0x40] sm:$0xff]  }
 0x1b2   :  { %3199 = vmatprep.subr.bf16.mxu1 %v4723_v29  ;;  %v4790_v29 = vld [vmem:[%s6389_s7 + $0xc0] sm:$0xff]  }
 0x1b4   :  { %2988 = vmatpush1.bf16.msra.mxu0 %v4718_v20  ;;  %v4791_v20 = vld [vmem:[%s6389_s7 + $0x80] sm:$0xff]  }
 0x1b5   :  { %3200 = vmatpush1.bf16.msra.mxu1 %v4721_v39  ;;  %2989 = vmatprep.subr.bf16.mxu0 %v4726_v26  ;;  %v4793_v39 = vld [vmem:[%s6389_s7] sm:$0xff]   ;;  %v4794_v26 = vld [vmem:[%s6389_s7 + $0xc8] sm:$0xff]  }
 0x1b6   :  { %3201 = vmatprep.subr.bf16.mxu1 %v4729_v59  ;;  %v4796_v59 = vld [vmem:[%s6389_s7 + $0x48] sm:$0xff]  }
 0x1b8   :  { %2990 = vmatpush1.bf16.msra.mxu0 %v4724_v2  ;;  %v4795_v2 = vld [vmem:[%s6389_s7 + $0x88] sm:$0xff]  }
 0x1b9   :  { %3202 = vmatpush1.bf16.msra.mxu1 %v4727_v27  ;;  %2991 = vmatprep.subr.bf16.mxu0 %v4732_v14  ;;  %v4797_v27 = vld [vmem:[%s6389_s7 + $0x8] sm:$0xff]   ;;  %v4798_v14 = vld [vmem:[%s6389_s7 + $0xd0] sm:$0xff]  }
 0x1ba   :  { %3203 = vmatprep.subr.bf16.mxu1 %v4735_v28  ;;  %v4801_v28 = vld [vmem:[%s6389_s7 + $0x10] sm:$0xff]  }
 0x1bc   :  { %2992 = vmatpush1.bf16.msra.mxu0 %v4730_v46  ;;  %v4802_v46 = vld [vmem:[%s6389_s7 + $0xd8] sm:$0xff]  }
 0x1bd   :  { %3204 = vmatpush1.bf16.msra.mxu1 %v4733_v30  ;;  %2993 = vmatprep.subr.bf16.mxu0 %v4738_v31  ;;  %v4804_v30 = vld [vmem:[%s6389_s7 + $0x58] sm:$0xff]  }
 0x1be   :  { %3205 = vmatprep.subr.bf16.mxu1 %v4741_v32  ;;  %v4803_v31 = vld [vmem:[%s6389_s7 + $0x98] sm:$0xff]  }
 0x1bf   :  { %v4805_v32 = vld [vmem:[%s6389_s7 + $0x18] sm:$0xff]  }
 0x1c0   :  { %2994 = vmatpush1.bf16.msra.mxu0 %v4736_v37  ;;  %v4806_v37 = vld [vmem:[%s6389_s7 + $0xe0] sm:$0xff]  }
 0x1c1   :  { %3206 = vmatpush1.bf16.msra.mxu1 %v4739_v38  ;;  %2995 = vmatprep.subr.bf16.mxu0 %v4744_v40  ;;  %v4807_v38 = vld [vmem:[%s6389_s7 + $0xa0] sm:$0xff]  }
 0x1c2   :  { %3207 = vmatprep.subr.bf16.mxu1 %v4747_v41  ;;  %v4809_v40 = vld [vmem:[%s6389_s7 + $0x20] sm:$0xff]   ;;  %v4810_v41 = vld [vmem:[%s6389_s7 + $0xe8] sm:$0xff]  }
 0x1c4   :  { %2996 = vmatpush1.bf16.msra.mxu0 %v4742_v42  ;;  %v4811_v42 = vld [vmem:[%s6389_s7 + $0xa8] sm:$0xff]  }
 0x1c5   :  { %3208 = vmatpush1.bf16.msra.mxu1 %v4745_v43  ;;  %2997 = vmatprep.subr.bf16.mxu0 %v4750_v44  ;;  %v4812_v43 = vld [vmem:[%s6389_s7 + $0x68] sm:$0xff]  }
 0x1c6   :  { %3209 = vmatprep.subr.bf16.mxu1 %v4753_v45  ;;  %v4813_v44 = vld [vmem:[%s6389_s7 + $0x28] sm:$0xff]   ;;  %v4814_v45 = vld [vmem:[%s6389_s7 + $0xf0] sm:$0xff]  }
 0x1c8   :  { %2998 = vmatpush1.bf16.msra.mxu0 %v4748_v47  ;;  %v4815_v47 = vld [vmem:[%s6389_s7 + $0xb0] sm:$0xff]  }
 0x1c9   :  { %3210 = vmatpush1.bf16.msra.mxu1 %v4751_v48  ;;  %2999 = vmatprep.subr.bf16.mxu0 %v4756_v49  ;;  %v4816_v48 = vld [vmem:[%s6389_s7 + $0x70] sm:$0xff]  }
 0x1ca   :  { %3211 = vmatprep.subr.bf16.mxu1 %v4759_v50  ;;  %v4817_v49 = vld [vmem:[%s6389_s7 + $0x30] sm:$0xff]   ;;  %v4818_v50 = vld [vmem:[%s6389_s7 + $0xf8] sm:$0xff]  }
 0x1cc   :  { %3000 = vmatpush1.bf16.msra.mxu0 %v4754_v51  ;;  %v4819_v51 = vld [vmem:[%s6389_s7 + $0xb8] sm:$0xff]  }
 0x1cd   :  { %3212 = vmatpush1.bf16.msra.mxu1 %v4757_v52  ;;  %3001 = vmatprep.subr.bf16.mxu0 %v4762_v53  ;;  %v4820_v52 = vld [vmem:[%s6389_s7 + $0x78] sm:$0xff]  }
 0x1ce   :  { %3213 = vmatprep.subr.bf16.mxu1 %v4765_v54  ;;  %v4821_v53 = vld [vmem:[%s6389_s7 + $0x38] sm:$0xff]   ;;  %v6321_v54 = vld [vmem:[%s6390_s9] sm:$0xff]  }
 0x1d0   :  { %3002 = vmatpush1.bf16.msra.mxu0 %v4760_v55  ;;  %v3244_v55 = vld [vmem:[%s6391_s6] sm:$0xf] }
 0x1d1   :  { %3214 = vmatpush1.bf16.msra.mxu1 %v4763_v58  ;;  %3003 = vmatprep.subr.bf16.mxu0 %v4768_v60  ;;  %v3257_v58 = vrot.slane %v3244_v55, %v183_v33  ;;  %v3249_v60 = vrot.slane %v3244_v55, %v175_v23 }
 0x1d2   :  { %3215 = vmatprep.subr.bf16.mxu1 %v4771_v22  ;;  %v3261_v22 = vrot.slane %v3244_v55, %v187_v36 }
 0x1d4   :  { %3004 = vmatpush1.bf16.msra.mxu0 %v4766_v57 }
 0x1d5   :  { %3216 = vmatpush1.bf16.msra.mxu1 %v4769_v62  ;;  %3005 = vmatprep.subr.bf16.mxu0 %v4774_v61  ;;  %v3253_v62 = vrot.slane %v3244_v55, %v179_v25 }
 0x1d6   :  { %3217 = vmatprep.subr.bf16.mxu1 %v4777_v0 }
 0x1d8   :  { %3006 = vmatpush1.bf16.msra.mxu0 %v4772_v24 }
 0x1d9   :  { %3218 = vmatpush1.bf16.msra.mxu1 %v4775_v7  ;;  %3007 = vmatprep.subr.bf16.mxu0 %v4780_v8 }
 0x1da   :  { %3219 = vmatprep.subr.bf16.mxu1 %v4783_v56 }
 0x1dc   :  { %3008 = vmatpush1.bf16.msra.mxu0 %v4778_v9 }
 0x1dd   :  { %3220 = vmatpush1.bf16.msra.mxu1 %v4781_v19  ;;  %3009 = vmatprep.subr.bf16.mxu0 %v4786_v10 }
 0x1de   :  { %3221 = vmatprep.subr.bf16.mxu1 %v4789_v34 }
 0x1e0   :  { %3010 = vmatpush1.bf16.msra.mxu0 %v4784_v11 }
 0x1e1   :  { %3222 = vmatpush1.bf16.msra.mxu1 %v4787_v12  ;;  %4241 = vmatprep.subr.bf16.mxu0 %v4792_v17 }
 0x1e2   :  { %4269 = vmatprep.subr.bf16.mxu1 %v4790_v29 }
 0x1e3   :  { %3012 = vmatmul.mubr.bf16.vlgmr.msra.gmra.mrb[16].mxu0 %v5834_v35 }
 0x1e4   :  { %3224 = vmatmul.mubr.bf16.vlgmr.msra.gmra.mrb[24].mxu1 %v5834_v35  ;;  %3021 = vmatprep.mubr.bf16.mxu0 %v5884_v1  ;;  %v4800_v35 = vld [vmem:[%s6389_s7 + $0x50] sm:$0xff]  }
 0x1e5   :  { %3233 = vmatprep.mubr.bf16.mxu1 %v5884_v1  ;;  %4270 = vmatpush3.bf16.msra.mxu1 %v4791_v20  ;;  %v4799_v1 = vld [vmem:[%s6389_s7 + $0x90] sm:$0xff]  }
 0x1e6   :  { %4242 = vmatpush3.bf16.msra.mxu0 %v4793_v39  ;;  %4271 = vmatprep.subr.bf16.mxu1 %v4794_v26 }
 0x1e7   :  { %4243 = vmatprep.subr.bf16.mxu0 %v4796_v59 }
 0x1e9   :  { %4272 = vmatpush3.bf16.msra.mxu1 %v4795_v2 }
 0x1ea   :  { %4244 = vmatpush3.bf16.msra.mxu0 %v4797_v27  ;;  %4273 = vmatprep.subr.bf16.mxu1 %v4798_v14 }
 0x1eb   :  { %3022 = vmatmul.mubr.bf16.gmra.mrb[20].mxu0 %v5876_v63  ;;  %4245 = vmatprep.subr.bf16.mxu0 %v4800_v35 }
 0x1ec   :  { %3234 = vmatmul.mubr.bf16.gmra.mrb[28].mxu1 %v5876_v63  ;;  %v4808_v63 = vld [vmem:[%s6389_s7 + $0x60] sm:$0xff]  }
 0x1ed   :  { %4274 = vmatpush3.bf16.msra.mxu1 %v4799_v1 }
 0x1ee   :  { %4246 = vmatpush3.bf16.msra.mxu0 %v4801_v28  ;;  %4275 = vmatprep.subr.bf16.mxu1 %v4802_v46 }
 0x1ef   :  { %4247 = vmatprep.subr.bf16.mxu0 %v4804_v30 }
 0x1f1   :  { %4276 = vmatpush3.bf16.msra.mxu1 %v4803_v31 }
 0x1f2   :  { %4248 = vmatpush3.bf16.msra.mxu0 %v4805_v32  ;;  %4277 = vmatprep.subr.bf16.mxu1 %v4806_v37 }
 0x1f3   :  { %4249 = vmatprep.subr.bf16.mxu0 %v4808_v63 }
 0x1f5   :  { %4278 = vmatpush3.bf16.msra.mxu1 %v4807_v38 }
 0x1f6   :  { %4250 = vmatpush3.bf16.msra.mxu0 %v4809_v40  ;;  %4279 = vmatprep.subr.bf16.mxu1 %v4810_v41 }
 0x1f7   :  { %4251 = vmatprep.subr.bf16.mxu0 %v4812_v43 }
 0x1f9   :  { %4280 = vmatpush3.bf16.msra.mxu1 %v4811_v42 }
 0x1fa   :  { %4252 = vmatpush3.bf16.msra.mxu0 %v4813_v44  ;;  %4281 = vmatprep.subr.bf16.mxu1 %v4814_v45  ;;  %v4823_v44 = vld [vmem:[%s6390_s9 + $0x8] sm:$0xff]  }
 0x1fb   :  { %4253 = vmatprep.subr.bf16.mxu0 %v4816_v48 }
 0x1fd   :  { %4282 = vmatpush3.bf16.msra.mxu1 %v4815_v47 }
 0x1fe   :  { %4254 = vmatpush3.bf16.msra.mxu0 %v4817_v49  ;;  %4283 = vmatprep.subr.bf16.mxu1 %v4818_v50 }
 0x1ff   :  { %4255 = vmatprep.subr.bf16.mxu0 %v4820_v52 }
 0x201   :  { %4284 = vmatpush3.bf16.msra.mxu1 %v4819_v51 }
 0x202   :  { %4256 = vmatpush3.bf16.msra.mxu0 %v4821_v53 }
 0x203   :  { %4307 = vmatprep.subr.bf16.mxu0 %v6321_v54 }
 0x2b6   :  { %v3013_v57 = vpop.f32.mrb[16].mxu0 }
 0x2b7   :  { %v4327_v61 = vadd.f32 %v3013_v57, %v5886_v3  ;;  %v3225_v0 = vpop.f32.mrb[24].mxu1  ;;  %v3015_v24 = vpop.f32.mrb[17].mxu0 }
 0x2b8   :  { %v3268_v7 = vadd.f32 %v3257_v58, %v3225_v0  ;;  %v4328_v8 = vadd.f32 %v3015_v24, %v5888_v4  ;;  %v3227_v56 = vpop.f32.mrb[25].mxu1  ;;  %v3017_v9 = vpop.f32.mrb[18].mxu0 }
 0x2b9   :  { %v3266_v33 = vadd.f32 %v4327_v61, %v3249_v60  ;;  %v3269_v19 = vadd.f32 %v3261_v22, %v3227_v56  ;;  %v4329_v23 = vadd.f32 %v3017_v9, %v5890_v5  ;;  %v3229_v10 = vpop.f32.mrb[26].mxu1  ;;  %v3019_v34 = vpop.f32.mrb[19].mxu0  ;;  %v4829_v56 = vld [vmem:[%s6390_s9 + $0x38] sm:$0xff]  }
 0x2ba   :  { %v3267_v36 = vadd.f32 %v4328_v8, %v3253_v62  ;;  %v3272_v11 = vadd.f32 %v3257_v58, %v3229_v10  ;;  %v4330_v21 = vadd.f32 %v3019_v34, %v5895_v6  ;;  %v3231_v25 = vpop.f32.mrb[27].mxu1  ;;  %v3284_v17 = vmax.f32 %v3268_v7, 0.0  ;;  %v4828_v8 = vld [vmem:[%s6390_s9 + $0x30] sm:$0xff]   ;;  %v4199_v34 = vld [vmem:[%s6392_s8] ss:$0 sm:$0xff] }
 0x2bb   :  { %v3270_v12 = vadd.f32 %v4329_v23, %v3249_v60  ;;  %v3273_v3 = vadd.f32 %v3261_v22, %v3231_v25  ;;  %v3282_v39 = vmax.f32 %v3266_v33, 0.0  ;;  %v3285_v4 = vmax.f32 %v3269_v19, 0.0 }
 0x2bc   :  { %v3288_v29 = vmax.f32 %v3272_v11, 0.0  ;;  %v3271_v20 = vadd.f32 %v4330_v21, %v3253_v62  ;;  %v3283_v2 = vmax.f32 %v3267_v36, 0.0 }
 0x2bd   :  { %v3286_v26 = vmax.f32 %v3270_v12, 0.0  ;;  %v3289_v59 = vmax.f32 %v3273_v3, 0.0 }
 0x2be   :  { %v3300_v27 = vpack.c.bf16 %v3288_v29, %v3284_v17  ;;  %v3287_v14 = vmax.f32 %v3271_v20, 0.0  ;;  %v3023_v5 = vpop.f32.mrb[20].mxu0 }
 0x2bf   :  { %v3298_v35 = vpack.c.bf16 %v3286_v26, %v3282_v39  ;;  %v3301_v1 = vpack.c.bf16 %v3289_v59, %v3285_v4  ;;  %v4331_v28 = vadd.f32 %v3023_v5, %v5918_v13  ;;  %v3235_v46 = vpop.f32.mrb[28].mxu1  ;;  %v3025_v6 = vpop.f32.mrb[21].mxu0 }
 0x2c0   :  { %v3276_v30 = vadd.f32 %v3257_v58, %v3235_v46  ;;  %v4332_v31 = vadd.f32 %v3025_v6, %v5920_v15  ;;  %v3237_v32 = vpop.f32.mrb[29].mxu1  ;;  %v3027_v37 = vpop.f32.mrb[22].mxu0  ;;  %v3299_v63 = vpack.c.bf16 %v3287_v14, %v3283_v2 }
 0x2c1   :  { %v3274_v38 = vadd.f32 %v4331_v28, %v3249_v60  ;;  %v3277_v40 = vadd.f32 %v3261_v22, %v3237_v32  ;;  %v4333_v41 = vadd.f32 %v3027_v37, %v5922_v16  ;;  %v3239_v42 = vpop.f32.mrb[30].mxu1  ;;  %3650 = vmatprep.mubr.bf16.mxu1 %v3301_v1  ;;  %v3029_v43 = vpop.f32.mrb[23].mxu0 }
 0x2c2   :  { %v3275_v13 = vadd.f32 %v4332_v31, %v3253_v62  ;;  %v3280_v45 = vadd.f32 %v3257_v58, %v3239_v42  ;;  %v4334_v47 = vadd.f32 %v3029_v43, %v5927_v18  ;;  %v3241_v48 = vpop.f32.mrb[31].mxu1  ;;  %3651 = vmatmul.mubr.bf16.vlgmr.msra.gmra.mrb[32].mxu1 %v3300_v27  ;;  %3601 = vmatprep.mubr.bf16.mxu0 %v3299_v63  ;;  %v3292_v50 = vmax.f32 %v3276_v30, 0.0 }
 0x2c3   :  { %v3278_v15 = vadd.f32 %v4333_v41, %v3249_v60  ;;  %v3281_v49 = vadd.f32 %v3261_v22, %v3241_v48  ;;  %3602 = vmatmul.mubr.bf16.vlgmr.msra.gmra.mrb[24].mxu0 %v3298_v35  ;;  %v3290_v52 = vmax.f32 %v3274_v38, 0.0  ;;  %v3293_v53 = vmax.f32 %v3277_v40, 0.0  ;;  %v4825_v60 = vld [vmem:[%s6390_s9 + $0x18] sm:$0xff]   ;;  %v4826_v22 = vld [vmem:[%s6390_s9 + $0x20] sm:$0xff]  }
 0x2c4   :  { %v3296_v51 = vmax.f32 %v3280_v45, 0.0  ;;  %v3279_v16 = vadd.f32 %v4334_v47, %v3253_v62  ;;  %4308 = vmatpush3.bf16.msra.mxu0 %v6321_v54  ;;  %v3291_v61 = vmax.f32 %v3275_v13, 0.0  ;;  %v4824_v54 = vld [vmem:[%s6390_s9 + $0x10] sm:$0xff]   ;;  %v4827_v62 = vld [vmem:[%s6390_s9 + $0x28] sm:$0xff]   ;;  %v4232_v13 = vld [vmem:[%s6393_s10] ss:$0 sm:$0xff] }
 0x2c5   :  { %v3294_v55 = vmax.f32 %v3278_v15, 0.0  ;;  %v3297_v57 = vmax.f32 %v3281_v49, 0.0  ;;  %4309 = vmatprep.subr.bf16.mxu0 %v4823_v44 }
 0x2c6   :  { %v3304_v58 = vpack.c.bf16 %v3296_v51, %v3292_v50  ;;  %v3295_v0 = vmax.f32 %v3279_v16, 0.0 }
 0x2c7   :  { %v3305_v18 = vpack.c.bf16 %v3297_v57, %v3293_v53  ;;  %v3302_v24 = vpack.c.bf16 %v3294_v55, %v3290_v52 }
 0x2c8   :  { %v3303_v7 = vpack.c.bf16 %v3295_v0, %v3291_v61  ;;  %4310 = vmatpush3.bf16.msra.mxu0 %v4823_v44 }
 0x2c9   :  { %3658 = vmatprep.mubr.bf16.mxu1 %v3305_v18  ;;  %4311 = vmatprep.subr.bf16.mxu0 %v4824_v54 }
 0x2ca   :  { %3659 = vmatmul.mubr.bf16.gmra.mrb[36].mxu1 %v3304_v58  ;;  %3609 = vmatprep.mubr.bf16.mxu0 %v3303_v7 }
 0x2cb   :  { %3610 = vmatmul.mubr.bf16.gmra.mrb[28].mxu0 %v3302_v24 }
 0x2cc   :  { %4312 = vmatpush3.bf16.msra.mxu0 %v4824_v54 }
 0x2cd   :  { %4313 = vmatprep.subr.bf16.mxu0 %v4825_v60 }
 0x2d0   :  { %4314 = vmatpush3.bf16.msra.mxu0 %v4825_v60 }
 0x2d1   :  { %4315 = vmatprep.subr.bf16.mxu0 %v4826_v22 }
 0x2d4   :  { %4316 = vmatpush3.bf16.msra.mxu0 %v4826_v22 }
 0x2d5   :  { %4317 = vmatprep.subr.bf16.mxu0 %v4827_v62 }
 0x2d8   :  { %4318 = vmatpush3.bf16.msra.mxu0 %v4827_v62 }
 0x2d9   :  { %4319 = vmatprep.subr.bf16.mxu0 %v4828_v8 }
 0x2dc   :  { %4320 = vmatpush3.bf16.msra.mxu0 %v4828_v8 }
 0x2dd   :  { %4321 = vmatprep.subr.bf16.mxu0 %v4829_v56 }
 0x2e0   :  { %4322 = vmatpush3.bf16.msra.mxu0 %v4829_v56 }
 0x395   :  { %v4285_v9 = vpop.f32.mrb[32].mxu1 }
 0x396   :  { %v4286_v33 = vpop.f32.mrb[33].mxu1  ;;  %v4257_v19 = vpop.f32.mrb[24].mxu0 }
 0x397   :  { %v4287_v23 = vadd.f32 %v4286_v33, %v4285_v9  ;;  %v4288_v10 = vpop.f32.mrb[34].mxu1  ;;  %v4258_v36 = vpop.f32.mrb[25].mxu0 }
 0x398   :  { %v4259_v11 = vadd.f32 %v4258_v36, %v4257_v19  ;;  %v4289_v21 = vpop.f32.mrb[35].mxu1  ;;  %v4260_v25 = vpop.f32.mrb[26].mxu0 }
 0x399   :  { %v4290_v12 = vadd.f32 %v4289_v21, %v4288_v10  ;;  %v4261_v3 = vpop.f32.mrb[27].mxu0 }
 0x39a   :  { %v3604_v17 = vadd.f32 %v4259_v11, %v4199_v34  ;;  %v4262_v29 = vadd.f32 %v4261_v3, %v4260_v25 }
 0x39c   :  { %v3653_v20 = vadd.f32 %v4287_v23, %v3604_v17  ;;  %v3607_v39 = vadd.f32 %v4262_v29, %v4199_v34 }
 0x39d   :  { %v4291_v4 = vpop.f32.mrb[36].mxu1 }
 0x39e   :  { %v3656_v26 = vadd.f32 %v4290_v12, %v3607_v39  ;;  %v4292_v59 = vpop.f32.mrb[37].mxu1  ;;  %v4263_v2 = vpop.f32.mrb[28].mxu0  ;;  %v3667_v35 = vmax.f32 %v3653_v20, 0.0 }
 0x39f   :  { %v4293_v27 = vadd.f32 %v4292_v59, %v4291_v4  ;;  %v4294_v14 = vpop.f32.mrb[38].mxu1  ;;  %v4264_v5 = vpop.f32.mrb[29].mxu0 }
 0x3a0   :  { %v3668_v1 = vmax.f32 %v3656_v26, 0.0  ;;  %v4265_v28 = vadd.f32 %v4264_v5, %v4263_v2  ;;  %v4295_v46 = vpop.f32.mrb[39].mxu1  ;;  %v4266_v6 = vpop.f32.mrb[30].mxu0 }
 0x3a1   :  { %v4296_v30 = vadd.f32 %v4295_v46, %v4294_v14  ;;  %v4267_v31 = vpop.f32.mrb[31].mxu0 }
 0x3a2   :  { %v3612_v32 = vadd.f32 %v4265_v28, %v4199_v34  ;;  %v4268_v37 = vadd.f32 %v4267_v31, %v4266_v6  ;;  %v3671_v63 = vpack.c.bf16 %v3668_v1, %v3667_v35 }
 0x3a4   :  { %v3661_v38 = vadd.f32 %v4293_v27, %v3612_v32  ;;  %v3615_v40 = vadd.f32 %v4268_v37, %v4199_v34  ;;  %4323 = vmatprep.mubr.bf16.mxu0 %v3671_v63 }
 0x3a6   :  { %v3664_v41 = vadd.f32 %v4296_v30, %v3615_v40  ;;  %v3669_v42 = vmax.f32 %v3661_v38, 0.0 }
 0x3a8   :  { %v3670_v43 = vmax.f32 %v3664_v41, 0.0 }
 0x3aa   :  { %v3672_v44 = vpack.c.bf16 %v3670_v43, %v3669_v42 }
 0x3ac   :  { %4324 = vmatmul.mubr.bf16.vlgmr.msra.gmra.mrb[32].mxu0 %v3672_v44 }
 0x47f   :  { %v4325_v45 = vpop.f32.mrb[32].mxu0 }
 0x480   :  { %v3787_v47 = vadd.f32 %v4325_v45, %v4232_v13  ;;  %v3778_v48 = vpop.f32.mrb[33].mxu0 }
 0x481   :  { %v3779_v15 = vadd.f32 %v4232_v13, %v3778_v48  ;;  %v4326_v49 = vpop.f32.mrb[34].mxu0 }
 0x482   :  { %3795 = vst [vmem:[%s6394_s11 + $0x10] sm:$0xff] %v3787_v47  ;;  %v3790_v50 = vadd.f32 %v4326_v49, %v4232_v13  ;;  %v3781_v51 = vpop.f32.mrb[35].mxu0 }
 0x483   :  { %3793 = vst [vmem:[%s6394_s11] sm:$0xff] %v3779_v15  ;;  %v3782_v16 = vadd.f32 %v4232_v13, %v3781_v51 }
 0x484   :  { %3796 = vst [vmem:[%s6394_s11 + $0x18] sm:$0xff] %v3790_v50 }
 0x485   :  { %3794 = vst [vmem:[%s6394_s11 + $0x8] sm:$0xff] %v3782_v16 }

</bundles_post_ra>
